<compile_context>
chip_gen: v7x
topology: tpu7x:2x2x1
jax: 0.10.0
libtpu: 0.0.40
codegen_flags: <defaults>
</compile_context>

<pallas_src>
import math

import jax
import jax.numpy as jnp
from jax.experimental import pallas as pl
from jax.experimental.pallas import tpu as pltpu

# ----- small synthetic shapes (consistent with the module's forward) -----
B, S, H = 2, 8, 32          # batch, seq, hidden
NH = 4                      # attention heads
HD = H // NH                # head dim
F = 4 * H                   # FFN intermediate (== 128)
VOCAB = 100
TYPE_VOCAB = 2
NUM_LABELS = 3              # output_classes = 3 (marg_classifier)
NUM_LAYERS = 2
LN_EPS = 1e-12

VEC_PAD = 128               # lane padding for packed bias/LN vectors
OUT_PAD = 128               # lane-dense classifier output width

# packed per-layer vector rows in `lvec` (NUM_LAYERS, N_VEC_ROWS, VEC_PAD)
ROW_BQKV = 0                # [:3H]  (q part already scaled by 1/sqrt(HD))
ROW_BO = 1                  # [:H]
ROW_LN1G, ROW_LN1B = 2, 3   # [:H]
ROW_BF1 = 4                 # [:F]
ROW_BF2 = 5                 # [:H]
ROW_LN2G, ROW_LN2B = 6, 7   # [:H]
N_VEC_ROWS = 8


# ------------------------------ kernel -----------------------------------
def _ln(x, g, b):
    mu = jnp.mean(x, axis=-1, keepdims=True)
    var = jnp.mean(jnp.square(x - mu), axis=-1, keepdims=True)
    return (x - mu) * jax.lax.rsqrt(var + LN_EPS) * g + b


def encoder_layer_kernel(x_ref, kmask_ref, gvec_ref,
                         wqkv_ref, wo_ref, wf1_ref, wf2_ref,
                         lvec_ref, clsw_ref, o_ref, resid_ref):
    """One (batch, layer) grid step.

    x_ref    : (S, H)   f32   embedded tokens of this batch element
    kmask_ref: (1, S)   f32   1 = valid key, 0 = padded
    gvec_ref : (3, VEC_PAD)   rows: emb_ln_g, emb_ln_b, cls_bias
    wqkv_ref : (H, 3H)  bf16  fused QKV weight of layer l (q cols pre-scaled)
    wo_ref   : (H, H)   bf16
    wf1_ref  : (H, F)   bf16
    wf2_ref  : (F, H)   bf16
    lvec_ref : (N_VEC_ROWS, VEC_PAD) f32 packed per-layer biases / LN params
    clsw_ref : (H, OUT_PAD) bf16 lane-padded classifier weight
    o_ref    : (S, OUT_PAD) f32 lane-dense logits (written at last layer)
    resid_ref: (S, H)   f32 VMEM scratch, residual stream across layers
    """
    l = pl.program_id(1)
    gvec = gvec_ref[...]

    # layer 0: embedding LayerNorm into the residual scratch (dropout = id).
    @pl.when(l == 0)
    def _():
        resid_ref[...] = _ln(x_ref[...], gvec[0:1, :H], gvec[1:2, :H])

    x = resid_ref[...]                            # (S, H) f32
    V = lvec_ref[...]                             # (N_VEC_ROWS, VEC_PAD) f32

    # key-padding additive bias computed in-kernel (no (T,T) mask in HBM).
    bias = (kmask_ref[...] - 1.0) * 1e9           # (1, S): 0 valid / -1e9 pad
    bias = bias[None, :, :]                       # (1, 1, S) -> bcast heads/queries

    xb = x.astype(jnp.bfloat16)

    # fused QKV projection (one MXU push); 1/sqrt(HD) folded into q at init.
    qkv = jnp.dot(xb, wqkv_ref[...], preferred_element_type=jnp.float32) \
        + V[ROW_BQKV:ROW_BQKV + 1, :3 * H]
    q = qkv[:, 0 * H:1 * H]
    k = qkv[:, 1 * H:2 * H]
    v = qkv[:, 2 * H:3 * H]

    # head-major views; no per-head lane slices, no explicit f32 transposes.
    q_h = q.reshape(S, NH, HD).swapaxes(0, 1).astype(jnp.bfloat16)   # (NH,S,HD)
    k_h = k.reshape(S, NH, HD).swapaxes(0, 1).astype(jnp.bfloat16)
    v_h = v.reshape(S, NH, HD).swapaxes(0, 1).astype(jnp.bfloat16)

    s = jnp.einsum('hqd,hkd->hqk', q_h, k_h,
                   preferred_element_type=jnp.float32)               # (NH,S,S)
    s = s + bias
    m = jnp.max(s, axis=-1, keepdims=True)
    p = jnp.exp(s - m)
    denom = jnp.sum(p, axis=-1, keepdims=True)
    p = p * pl.reciprocal(denom, approx=True)     # EUP, frees VALU

    # token-major context -> contiguous (S, H) reshape (no (H,T).T copy).
    ctx = jnp.einsum('hqk,hkd->qhd', p.astype(jnp.bfloat16), v_h,
                     preferred_element_type=jnp.float32).reshape(S, H)

    attn = jnp.dot(ctx.astype(jnp.bfloat16), wo_ref[...],
                   preferred_element_type=jnp.float32) + V[ROW_BO:ROW_BO + 1, :H]
    h1 = _ln(x + attn, V[ROW_LN1G:ROW_LN1G + 1, :H], V[ROW_LN1B:ROW_LN1B + 1, :H])

    ff = jnp.dot(h1.astype(jnp.bfloat16), wf1_ref[...],
                 preferred_element_type=jnp.float32) + V[ROW_BF1:ROW_BF1 + 1, :F]
    ff = jax.nn.gelu(ff, approximate=True)        # tanh GELU -> EUP slot
    ff = jnp.dot(ff.astype(jnp.bfloat16), wf2_ref[...],
                 preferred_element_type=jnp.float32) + V[ROW_BF2:ROW_BF2 + 1, :H]
    xo = _ln(h1 + ff, V[ROW_LN2G:ROW_LN2G + 1, :H], V[ROW_LN2B:ROW_LN2B + 1, :H])
    resid_ref[...] = xo

    # last layer: token-wise marg_classifier into a lane-dense padded output.
    @pl.when(l == NUM_LAYERS - 1)
    def _():
        o_ref[...] = jnp.dot(xo.astype(jnp.bfloat16), clsw_ref[...],
                             preferred_element_type=jnp.float32) + gvec[2:3, :]


# ------------------------------ wrapper -----------------------------------
@jax.jit
def transformer_classifier_forward(params, input_ids, token_type_ids, attention_mask):
    # --- embeddings (gather = glue) outside the kernel ---
    x = (jnp.take(params['word_emb'], input_ids, axis=0)
         + jnp.take(params['type_emb'], token_type_ids, axis=0)
         + params['pos_emb'][None, :, :]).astype(jnp.float32)        # (B, S, H)
    kmask = attention_mask.astype(jnp.float32).reshape(B, 1, S)      # (B, 1, S)

    grid_spec = pltpu.PrefetchScalarGridSpec(
        num_scalar_prefetch=0,
        grid=(B, NUM_LAYERS),
        in_specs=[
            pl.BlockSpec((None, S, H), lambda b, l: (b, 0, 0)),              # x
            pl.BlockSpec((None, 1, S), lambda b, l: (b, 0, 0)),              # key mask
            pl.BlockSpec((3, VEC_PAD), lambda b, l: (0, 0)),                 # gvec
            pl.BlockSpec((None, H, 3 * H), lambda b, l: (l, 0, 0)),          # wqkv
            pl.BlockSpec((None, H, H), lambda b, l: (l, 0, 0)),              # wo
            pl.BlockSpec((None, H, F), lambda b, l: (l, 0, 0)),              # wf1
            pl.BlockSpec((None, F, H), lambda b, l: (l, 0, 0)),              # wf2
            pl.BlockSpec((None, N_VEC_ROWS, VEC_PAD), lambda b, l: (l, 0, 0)),  # lvec
            pl.BlockSpec((H, OUT_PAD), lambda b, l: (0, 0)),                 # clsw
        ],
        out_specs=pl.BlockSpec((None, S, OUT_PAD), lambda b, l: (b, 0, 0)),
        scratch_shapes=[pltpu.VMEM((S, H), jnp.float32)],                    # residual
    )

    logits_pad = pl.pallas_call(
        encoder_layer_kernel,
        out_shape=jax.ShapeDtypeStruct((B, S, OUT_PAD), jnp.float32),
        grid_spec=grid_spec,
        compiler_params=pltpu.CompilerParams(
            dimension_semantics=("parallel", "arbitrary"),   # batch across TCs (v7x)
            vmem_limit_bytes=64 * 1024 * 1024),               # headroom; re-derive on v7x
    )(x, kmask, params['gvec'], params['wqkv'], params['wo'],
      params['wf1'], params['wf2'], params['lvec'], params['cls_w'])

    # dropout -> identity at inference; slice padded lanes down to 3 labels
    return logits_pad[:, :, :NUM_LABELS]


# --------------------------- parameter init -------------------------------
def init_params(key):
    def normal(k, shape, scale=0.02):
        return (scale * jax.random.normal(k, shape)).astype(jnp.float32)

    ks = iter(jax.random.split(key, 24))

    # fused QKV with 1/sqrt(HD) folded into q (weight + bias) at init time.
    wq = normal(next(ks), (NUM_LAYERS, H, H))
    wk = normal(next(ks), (NUM_LAYERS, H, H))
    wv = normal(next(ks), (NUM_LAYERS, H, H))
    bq = normal(next(ks), (NUM_LAYERS, H))
    bk = normal(next(ks), (NUM_LAYERS, H))
    bv = normal(next(ks), (NUM_LAYERS, H))
    inv_sqrt_hd = 1.0 / math.sqrt(HD)
    wq = wq * inv_sqrt_hd
    bq = bq * inv_sqrt_hd
    wqkv = jnp.concatenate([wq, wk, wv], axis=-1)          # (L, H, 3H)

    params = {
        'word_emb': normal(next(ks), (VOCAB, H)),
        'type_emb': normal(next(ks), (TYPE_VOCAB, H)),
        'pos_emb': normal(next(ks), (S, H)),
        # bf16 weight stacks (one array per weight kind, stacked over layers)
        'wqkv': wqkv.astype(jnp.bfloat16),
        'wo': normal(next(ks), (NUM_LAYERS, H, H)).astype(jnp.bfloat16),
        'wf1': normal(next(ks), (NUM_LAYERS, H, F)).astype(jnp.bfloat16),
        'wf2': normal(next(ks), (NUM_LAYERS, F, H)).astype(jnp.bfloat16),
    }

    # packed per-layer bias / LayerNorm vectors (f32, lane-padded rows)
    lvec = jnp.zeros((NUM_LAYERS, N_VEC_ROWS, VEC_PAD), jnp.float32)
    lvec = lvec.at[:, ROW_BQKV, 0 * H:1 * H].set(bq)
    lvec = lvec.at[:, ROW_BQKV, 1 * H:2 * H].set(bk)
    lvec = lvec.at[:, ROW_BQKV, 2 * H:3 * H].set(bv)
    lvec = lvec.at[:, ROW_BO, :H].set(normal(next(ks), (NUM_LAYERS, H)))
    lvec = lvec.at[:, ROW_LN1G, :H].set(1.0)
    lvec = lvec.at[:, ROW_BF1, :F].set(normal(next(ks), (NUM_LAYERS, F)))
    lvec = lvec.at[:, ROW_BF2, :H].set(normal(next(ks), (NUM_LAYERS, H)))
    lvec = lvec.at[:, ROW_LN2G, :H].set(1.0)
    params['lvec'] = lvec

    # global packed vectors: embedding-LN gamma/beta + classifier bias
    gvec = jnp.zeros((3, VEC_PAD), jnp.float32)
    gvec = gvec.at[0, :H].set(1.0)
    gvec = gvec.at[2, :NUM_LABELS].set(normal(next(ks), (NUM_LABELS,)))
    params['gvec'] = gvec

    # lane-padded classifier weight (only first NUM_LABELS columns are used)
    cls_w = jnp.zeros((H, OUT_PAD), jnp.float32)
    cls_w = cls_w.at[:, :NUM_LABELS].set(normal(next(ks), (H, NUM_LABELS)))
    params['cls_w'] = cls_w.astype(jnp.bfloat16)
    return params


# -------------------------------- main -------------------------------------
if __name__ == "__main__":
    root = jax.random.PRNGKey(0)
    k_param, k_ids = jax.random.split(root)

    params = init_params(k_param)

    input_ids = jax.random.randint(k_ids, (B, S), 0, VOCAB, dtype=jnp.int32)
    token_type_ids = jnp.zeros((B, S), jnp.int32)
    attention_mask = jnp.ones((B, S), jnp.int32).at[1, -2:].set(0)  # padding in batch 1

    logits = transformer_classifier_forward(params, input_ids, token_type_ids,
                                            attention_mask)
    logits = jax.block_until_ready(logits)
    assert logits.shape == (B, S, NUM_LABELS)
    assert bool(jnp.all(jnp.isfinite(logits)))
    print("KERNEL_OK")
</pallas_src>

<mosaic_0001>
module attributes {stable_mosaic.version = 11 : i64} {
  func.func @encoder_layer_kernel(%arg0: i32, %arg1: i32, %arg2: memref<1x8x32xf32, #tpu.memory_space<vmem>>, %arg3: memref<1x1x8xf32, #tpu.memory_space<vmem>>, %arg4: memref<3x128xf32, #tpu.memory_space<vmem>>, %arg5: memref<1x32x96xbf16, #tpu.memory_space<vmem>>, %arg6: memref<1x32x32xbf16, #tpu.memory_space<vmem>>, %arg7: memref<1x32x128xbf16, #tpu.memory_space<vmem>>, %arg8: memref<1x128x32xbf16, #tpu.memory_space<vmem>>, %arg9: memref<1x8x128xf32, #tpu.memory_space<vmem>>, %arg10: memref<32x128xbf16, #tpu.memory_space<vmem>>, %arg11: memref<1x8x128xf32, #tpu.memory_space<vmem>>, %arg12: memref<8x32xf32, #tpu.memory_space<vmem>>) attributes {dimension_semantics = [#tpu.dimension_semantics<parallel>, #tpu.dimension_semantics<arbitrary>], iteration_bounds = array<i64: 2, 2>, scalar_prefetch = 0 : i64, scratch_operands = 1 : i64, tpu.core_type = #tpu.core_type<tc>, window_params = [{transform_indices = @transform_0, window_bounds = array<i64: 1, 8, 32>}, {transform_indices = @transform_1, window_bounds = array<i64: 1, 1, 8>}, {pipeline_mode = #tpu.pipeline_mode<synchronous>, transform_indices = @transform_2, window_bounds = array<i64: 3, 128>}, {transform_indices = @transform_3, window_bounds = array<i64: 1, 32, 96>}, {transform_indices = @transform_4, window_bounds = array<i64: 1, 32, 32>}, {transform_indices = @transform_5, window_bounds = array<i64: 1, 32, 128>}, {transform_indices = @transform_6, window_bounds = array<i64: 1, 128, 32>}, {transform_indices = @transform_7, window_bounds = array<i64: 1, 8, 128>}, {pipeline_mode = #tpu.pipeline_mode<synchronous>, transform_indices = @transform_8, window_bounds = array<i64: 32, 128>}, {transform_indices = @transform_9, window_bounds = array<i64: 1, 8, 128>}]} {
    %c0 = arith.constant 0 : index
    %c0_0 = arith.constant 0 : index
    %0 = vector.load %arg4[%c0, %c0_0] : memref<3x128xf32, #tpu.memory_space<vmem>>, vector<3x128xf32>
    %c0_i32 = arith.constant 0 : i32
    %1 = arith.cmpi eq, %arg1, %c0_i32 : i32
    %2 = arith.extui %1 : i1 to i32
    %c0_i32_1 = arith.constant 0 : i32
    %3 = arith.cmpi ne, %2, %c0_i32_1 : i32
    scf.if %3 {
      %c0_48 = arith.constant 0 : index
      %c0_49 = arith.constant 0 : index
      %c0_50 = arith.constant 0 : index
      %138 = vector.load %arg2[%c0_48, %c0_49, %c0_50] : memref<1x8x32xf32, #tpu.memory_space<vmem>>, vector<1x8x32xf32>
      %139 = vector.shape_cast %138 : vector<1x8x32xf32> to vector<8x32xf32>
      %140 = vector.extract_strided_slice %0 {offsets = [0, 0], sizes = [1, 32], strides = [1, 1]} : vector<3x128xf32> to vector<1x32xf32>
      %141 = vector.extract_strided_slice %0 {offsets = [1, 0], sizes = [1, 32], strides = [1, 1]} : vector<3x128xf32> to vector<1x32xf32>
      %cst_51 = arith.constant dense<0.000000e+00> : vector<8xf32>
      %142 = vector.multi_reduction <add>, %139, %cst_51 [1] : vector<8x32xf32> to vector<8xf32>
      %143 = vector.shape_cast %142 : vector<8xf32> to vector<8x1xf32>
      %cst_52 = arith.constant 3.200000e+01 : f32
      %144 = vector.broadcast %cst_52 : f32 to vector<8x1xf32>
      %145 = arith.divf %143, %144 : vector<8x1xf32>
      %146 = vector.broadcast %145 : vector<8x1xf32> to vector<8x32xf32>
      %147 = arith.subf %139, %146 : vector<8x32xf32>
      %148 = arith.mulf %147, %147 : vector<8x32xf32>
      %cst_53 = arith.constant dense<0.000000e+00> : vector<8xf32>
      %149 = vector.multi_reduction <add>, %148, %cst_53 [1] : vector<8x32xf32> to vector<8xf32>
      %150 = vector.shape_cast %149 : vector<8xf32> to vector<8x1xf32>
      %cst_54 = arith.constant 3.200000e+01 : f32
      %151 = vector.broadcast %cst_54 : f32 to vector<8x1xf32>
      %152 = arith.divf %150, %151 : vector<8x1xf32>
      %153 = vector.broadcast %145 : vector<8x1xf32> to vector<8x32xf32>
      %154 = arith.subf %139, %153 : vector<8x32xf32>
      %cst_55 = arith.constant 9.99999996E-13 : f32
      %155 = vector.broadcast %cst_55 : f32 to vector<8x1xf32>
      %156 = arith.addf %152, %155 : vector<8x1xf32>
      %157 = math.rsqrt %156 : vector<8x1xf32>
      %158 = vector.broadcast %157 : vector<8x1xf32> to vector<8x32xf32>
      %159 = arith.mulf %154, %158 : vector<8x32xf32>
      %160 = vector.broadcast %140 : vector<1x32xf32> to vector<8x32xf32>
      %161 = arith.mulf %159, %160 : vector<8x32xf32>
      %162 = vector.broadcast %141 : vector<1x32xf32> to vector<8x32xf32>
      %163 = arith.addf %161, %162 : vector<8x32xf32>
      %c0_56 = arith.constant 0 : index
      %c0_57 = arith.constant 0 : index
      %164 = vector.load %arg12[%c0_56, %c0_57] : memref<8x32xf32, #tpu.memory_space<vmem>>, vector<8x32xf32>
      tpu.vector_store %arg12[%c0_56, %c0_57], %163 {strides = array<i32>} : memref<8x32xf32, #tpu.memory_space<vmem>>, vector<8x32xf32>,
    } else {
    }
    %c0_2 = arith.constant 0 : index
    %c0_3 = arith.constant 0 : index
    %4 = vector.load %arg12[%c0_2, %c0_3] : memref<8x32xf32, #tpu.memory_space<vmem>>, vector<8x32xf32>
    %c0_4 = arith.constant 0 : index
    %c0_5 = arith.constant 0 : index
    %c0_6 = arith.constant 0 : index
    %5 = vector.load %arg9[%c0_4, %c0_5, %c0_6] : memref<1x8x128xf32, #tpu.memory_space<vmem>>, vector<1x8x128xf32>
    %6 = vector.shape_cast %5 : vector<1x8x128xf32> to vector<8x128xf32>
    %c0_7 = arith.constant 0 : index
    %c0_8 = arith.constant 0 : index
    %c0_9 = arith.constant 0 : index
    %7 = vector.load %arg3[%c0_7, %c0_8, %c0_9] : memref<1x1x8xf32, #tpu.memory_space<vmem>>, vector<1x1x8xf32>
    %8 = vector.shape_cast %7 : vector<1x1x8xf32> to vector<1x8xf32>
    %cst = arith.constant 1.000000e+00 : f32
    %9 = vector.broadcast %cst : f32 to vector<1x8xf32>
    %10 = arith.subf %8, %9 : vector<1x8xf32>
    %cst_10 = arith.constant 1.000000e+09 : f32
    %11 = vector.broadcast %cst_10 : f32 to vector<1x8xf32>
    %12 = arith.mulf %10, %11 : vector<1x8xf32>
    %13 = vector.shape_cast %12 : vector<1x8xf32> to vector<1x1x8xf32>
    %14 = arith.truncf %4 : vector<8x32xf32> to vector<8x32xbf16>
    %c0_11 = arith.constant 0 : index
    %c0_12 = arith.constant 0 : index
    %c0_13 = arith.constant 0 : index
    %15 = vector.load %arg5[%c0_11, %c0_12, %c0_13] : memref<1x32x96xbf16, #tpu.memory_space<vmem>>, vector<1x32x96xbf16>
    %16 = vector.shape_cast %15 : vector<1x32x96xbf16> to vector<32x96xbf16>
    %cst_14 = arith.constant dense<0.000000e+00> : vector<8x96xf32>
    %17 = tpu.matmul %14, %16, %cst_14 {dimension_numbers = #tpu.dot_dimension_numbers<[1], [0], [0], [1], [0, 0, 1, 1], [], []>} : vector<8x32xbf16>, vector<32x96xbf16>, vector<8x96xf32> -> vector<8x96xf32>
    %18 = vector.extract_strided_slice %6 {offsets = [0, 0], sizes = [1, 96], strides = [1, 1]} : vector<8x128xf32> to vector<1x96xf32>
    %19 = vector.broadcast %18 : vector<1x96xf32> to vector<8x96xf32>
    %20 = arith.addf %17, %19 : vector<8x96xf32>
    %21 = vector.extract_strided_slice %20 {offsets = [0, 0], sizes = [8, 32], strides = [1, 1]} : vector<8x96xf32> to vector<8x32xf32>
    %22 = vector.extract_strided_slice %20 {offsets = [0, 32], sizes = [8, 32], strides = [1, 1]} : vector<8x96xf32> to vector<8x32xf32>
    %23 = vector.extract_strided_slice %20 {offsets = [0, 64], sizes = [8, 32], strides = [1, 1]} : vector<8x96xf32> to vector<8x32xf32>
    %24 = vector.shape_cast %21 : vector<8x32xf32> to vector<8x4x8xf32>
    %25 = tpu.transpose %24, [1, 0, 2] : vector<8x4x8xf32> -> vector<4x8x8xf32>
    %26 = arith.truncf %25 : vector<4x8x8xf32> to vector<4x8x8xbf16>
    %27 = vector.shape_cast %22 : vector<8x32xf32> to vector<8x4x8xf32>
    %28 = tpu.transpose %27, [1, 0, 2] : vector<8x4x8xf32> -> vector<4x8x8xf32>
    %29 = arith.truncf %28 : vector<4x8x8xf32> to vector<4x8x8xbf16>
    %30 = vector.shape_cast %23 : vector<8x32xf32> to vector<8x4x8xf32>
    %31 = tpu.transpose %30, [1, 0, 2] : vector<8x4x8xf32> -> vector<4x8x8xf32>
    %32 = arith.truncf %31 : vector<4x8x8xf32> to vector<4x8x8xbf16>
    "tpu.trace_start"() <{level = 10 : i32, message = "hqd,hkd->hqk"}> : () -> ()
    %cst_15 = arith.constant dense<0.000000e+00> : vector<4x8x8xf32>
    %33 = tpu.matmul %26, %29, %cst_15 {dimension_numbers = #tpu.dot_dimension_numbers<[2], [2], [1], [1], [0, 0, 0, 1, 1, 1], [0], [0]>} : vector<4x8x8xbf16>, vector<4x8x8xbf16>, vector<4x8x8xf32> -> vector<4x8x8xf32>
    "tpu.trace_stop"() : () -> ()
    %34 = vector.broadcast %13 : vector<1x1x8xf32> to vector<4x8x8xf32>
    %35 = arith.addf %33, %34 : vector<4x8x8xf32>
    %cst_16 = arith.constant dense<0xFF800000> : vector<4x8xf32>
    %36 = vector.multi_reduction <maximumf>, %35, %cst_16 [2] : vector<4x8x8xf32> to vector<4x8xf32>
    %37 = vector.shape_cast %36 : vector<4x8xf32> to vector<4x8x1xf32>
    %38 = vector.broadcast %37 : vector<4x8x1xf32> to vector<4x8x8xf32>
    %39 = arith.subf %35, %38 : vector<4x8x8xf32>
    %40 = math.exp %39 : vector<4x8x8xf32>
    %cst_17 = arith.constant dense<0.000000e+00> : vector<4x8xf32>
    %41 = vector.multi_reduction <add>, %40, %cst_17 [2] : vector<4x8x8xf32> to vector<4x8xf32>
    %42 = vector.shape_cast %41 : vector<4x8xf32> to vector<4x8x1xf32>
    %43 = tpu.reciprocal %42 {approx = true} : vector<4x8x1xf32> -> vector<4x8x1xf32>
    %44 = vector.broadcast %43 : vector<4x8x1xf32> to vector<4x8x8xf32>
    %45 = arith.mulf %40, %44 : vector<4x8x8xf32>
    %46 = arith.truncf %45 : vector<4x8x8xf32> to vector<4x8x8xbf16>
    "tpu.trace_start"() <{level = 10 : i32, message = "hqk,hkd->qhd"}> : () -> ()
    %cst_18 = arith.constant dense<0.000000e+00> : vector<4x8x8xf32>
    %47 = tpu.matmul %32, %46, %cst_18 {dimension_numbers = #tpu.dot_dimension_numbers<[1], [2], [2], [1], [0, 0, 0, 2, 1, 1], [0], [0]>} : vector<4x8x8xbf16>, vector<4x8x8xbf16>, vector<4x8x8xf32> -> vector<4x8x8xf32>
    %48 = tpu.transpose %47, [2, 0, 1] : vector<4x8x8xf32> -> vector<8x4x8xf32>
    "tpu.trace_stop"() : () -> ()
    %49 = vector.shape_cast %48 : vector<8x4x8xf32> to vector<8x32xf32>
    %50 = arith.truncf %49 : vector<8x32xf32> to vector<8x32xbf16>
    %c0_19 = arith.constant 0 : index
    %c0_20 = arith.constant 0 : index
    %c0_21 = arith.constant 0 : index
    %51 = vector.load %arg6[%c0_19, %c0_20, %c0_21] : memref<1x32x32xbf16, #tpu.memory_space<vmem>>, vector<1x32x32xbf16>
    %52 = vector.shape_cast %51 : vector<1x32x32xbf16> to vector<32x32xbf16>
    %cst_22 = arith.constant dense<0.000000e+00> : vector<8x32xf32>
    %53 = tpu.matmul %50, %52, %cst_22 {dimension_numbers = #tpu.dot_dimension_numbers<[1], [0], [0], [1], [0, 0, 1, 1], [], []>} : vector<8x32xbf16>, vector<32x32xbf16>, vector<8x32xf32> -> vector<8x32xf32>
    %54 = vector.extract_strided_slice %6 {offsets = [1, 0], sizes = [1, 32], strides = [1, 1]} : vector<8x128xf32> to vector<1x32xf32>
    %55 = vector.broadcast %54 : vector<1x32xf32> to vector<8x32xf32>
    %56 = arith.addf %53, %55 : vector<8x32xf32>
    %57 = arith.addf %4, %56 : vector<8x32xf32>
    %58 = vector.extract_strided_slice %6 {offsets = [2, 0], sizes = [1, 32], strides = [1, 1]} : vector<8x128xf32> to vector<1x32xf32>
    %59 = vector.extract_strided_slice %6 {offsets = [3, 0], sizes = [1, 32], strides = [1, 1]} : vector<8x128xf32> to vector<1x32xf32>
    %cst_23 = arith.constant dense<0.000000e+00> : vector<8xf32>
    %60 = vector.multi_reduction <add>, %57, %cst_23 [1] : vector<8x32xf32> to vector<8xf32>
    %61 = vector.shape_cast %60 : vector<8xf32> to vector<8x1xf32>
    %cst_24 = arith.constant 3.200000e+01 : f32
    %62 = vector.broadcast %cst_24 : f32 to vector<8x1xf32>
    %63 = arith.divf %61, %62 : vector<8x1xf32>
    %64 = vector.broadcast %63 : vector<8x1xf32> to vector<8x32xf32>
    %65 = arith.subf %57, %64 : vector<8x32xf32>
    %66 = arith.mulf %65, %65 : vector<8x32xf32>
    %cst_25 = arith.constant dense<0.000000e+00> : vector<8xf32>
    %67 = vector.multi_reduction <add>, %66, %cst_25 [1] : vector<8x32xf32> to vector<8xf32>
    %68 = vector.shape_cast %67 : vector<8xf32> to vector<8x1xf32>
    %cst_26 = arith.constant 3.200000e+01 : f32
    %69 = vector.broadcast %cst_26 : f32 to vector<8x1xf32>
    %70 = arith.divf %68, %69 : vector<8x1xf32>
    %71 = vector.broadcast %63 : vector<8x1xf32> to vector<8x32xf32>
    %72 = arith.subf %57, %71 : vector<8x32xf32>
    %cst_27 = arith.constant 9.99999996E-13 : f32
    %73 = vector.broadcast %cst_27 : f32 to vector<8x1xf32>
    %74 = arith.addf %70, %73 : vector<8x1xf32>
    %75 = math.rsqrt %74 : vector<8x1xf32>
    %76 = vector.broadcast %75 : vector<8x1xf32> to vector<8x32xf32>
    %77 = arith.mulf %72, %76 : vector<8x32xf32>
    %78 = vector.broadcast %58 : vector<1x32xf32> to vector<8x32xf32>
    %79 = arith.mulf %77, %78 : vector<8x32xf32>
    %80 = vector.broadcast %59 : vector<1x32xf32> to vector<8x32xf32>
    %81 = arith.addf %79, %80 : vector<8x32xf32>
    %82 = arith.truncf %81 : vector<8x32xf32> to vector<8x32xbf16>
    %c0_28 = arith.constant 0 : index
    %c0_29 = arith.constant 0 : index
    %c0_30 = arith.constant 0 : index
    %83 = vector.load %arg7[%c0_28, %c0_29, %c0_30] : memref<1x32x128xbf16, #tpu.memory_space<vmem>>, vector<1x32x128xbf16>
    %84 = vector.shape_cast %83 : vector<1x32x128xbf16> to vector<32x128xbf16>
    %cst_31 = arith.constant dense<0.000000e+00> : vector<8x128xf32>
    %85 = tpu.matmul %82, %84, %cst_31 {dimension_numbers = #tpu.dot_dimension_numbers<[1], [0], [0], [1], [0, 0, 1, 1], [], []>} : vector<8x32xbf16>, vector<32x128xbf16>, vector<8x128xf32> -> vector<8x128xf32>
    %86 = vector.extract_strided_slice %6 {offsets = [4, 0], sizes = [1, 128], strides = [1, 1]} : vector<8x128xf32> to vector<1x128xf32>
    %87 = vector.broadcast %86 : vector<1x128xf32> to vector<8x128xf32>
    %88 = arith.addf %85, %87 : vector<8x128xf32>
    %89 = arith.mulf %88, %88 : vector<8x128xf32>
    %90 = arith.mulf %88, %89 : vector<8x128xf32>
    %cst_32 = arith.constant 4.471500e-02 : f32
    %91 = vector.broadcast %cst_32 : f32 to vector<8x128xf32>
    %92 = arith.mulf %91, %90 : vector<8x128xf32>
    %93 = arith.addf %88, %92 : vector<8x128xf32>
    %cst_33 = arith.constant 0.797884583 : f32
    %94 = vector.broadcast %cst_33 : f32 to vector<8x128xf32>
    %95 = arith.mulf %94, %93 : vector<8x128xf32>
    %96 = math.tanh %95 : vector<8x128xf32>
    %cst_34 = arith.constant 1.000000e+00 : f32
    %97 = vector.broadcast %cst_34 : f32 to vector<8x128xf32>
    %98 = arith.addf %97, %96 : vector<8x128xf32>
    %cst_35 = arith.constant 5.000000e-01 : f32
    %99 = vector.broadcast %cst_35 : f32 to vector<8x128xf32>
    %100 = arith.mulf %99, %98 : vector<8x128xf32>
    %101 = arith.mulf %88, %100 : vector<8x128xf32>
    %102 = arith.truncf %101 : vector<8x128xf32> to vector<8x128xbf16>
    %c0_36 = arith.constant 0 : index
    %c0_37 = arith.constant 0 : index
    %c0_38 = arith.constant 0 : index
    %103 = vector.load %arg8[%c0_36, %c0_37, %c0_38] : memref<1x128x32xbf16, #tpu.memory_space<vmem>>, vector<1x128x32xbf16>
    %104 = vector.shape_cast %103 : vector<1x128x32xbf16> to vector<128x32xbf16>
    %cst_39 = arith.constant dense<0.000000e+00> : vector<8x32xf32>
    %105 = tpu.matmul %102, %104, %cst_39 {dimension_numbers = #tpu.dot_dimension_numbers<[1], [0], [0], [1], [0, 0, 1, 1], [], []>} : vector<8x128xbf16>, vector<128x32xbf16>, vector<8x32xf32> -> vector<8x32xf32>
    %106 = vector.extract_strided_slice %6 {offsets = [5, 0], sizes = [1, 32], strides = [1, 1]} : vector<8x128xf32> to vector<1x32xf32>
    %107 = vector.broadcast %106 : vector<1x32xf32> to vector<8x32xf32>
    %108 = arith.addf %105, %107 : vector<8x32xf32>
    %109 = arith.addf %81, %108 : vector<8x32xf32>
    %110 = vector.extract_strided_slice %6 {offsets = [6, 0], sizes = [1, 32], strides = [1, 1]} : vector<8x128xf32> to vector<1x32xf32>
    %111 = vector.extract_strided_slice %6 {offsets = [7, 0], sizes = [1, 32], strides = [1, 1]} : vector<8x128xf32> to vector<1x32xf32>
    %cst_40 = arith.constant dense<0.000000e+00> : vector<8xf32>
    %112 = vector.multi_reduction <add>, %109, %cst_40 [1] : vector<8x32xf32> to vector<8xf32>
    %113 = vector.shape_cast %112 : vector<8xf32> to vector<8x1xf32>
    %cst_41 = arith.constant 3.200000e+01 : f32
    %114 = vector.broadcast %cst_41 : f32 to vector<8x1xf32>
    %115 = arith.divf %113, %114 : vector<8x1xf32>
    %116 = vector.broadcast %115 : vector<8x1xf32> to vector<8x32xf32>
    %117 = arith.subf %109, %116 : vector<8x32xf32>
    %118 = arith.mulf %117, %117 : vector<8x32xf32>
    %cst_42 = arith.constant dense<0.000000e+00> : vector<8xf32>
    %119 = vector.multi_reduction <add>, %118, %cst_42 [1] : vector<8x32xf32> to vector<8xf32>
    %120 = vector.shape_cast %119 : vector<8xf32> to vector<8x1xf32>
    %cst_43 = arith.constant 3.200000e+01 : f32
    %121 = vector.broadcast %cst_43 : f32 to vector<8x1xf32>
    %122 = arith.divf %120, %121 : vector<8x1xf32>
    %123 = vector.broadcast %115 : vector<8x1xf32> to vector<8x32xf32>
    %124 = arith.subf %109, %123 : vector<8x32xf32>
    %cst_44 = arith.constant 9.99999996E-13 : f32
    %125 = vector.broadcast %cst_44 : f32 to vector<8x1xf32>
    %126 = arith.addf %122, %125 : vector<8x1xf32>
    %127 = math.rsqrt %126 : vector<8x1xf32>
    %128 = vector.broadcast %127 : vector<8x1xf32> to vector<8x32xf32>
    %129 = arith.mulf %124, %128 : vector<8x32xf32>
    %130 = vector.broadcast %110 : vector<1x32xf32> to vector<8x32xf32>
    %131 = arith.mulf %129, %130 : vector<8x32xf32>
    %132 = vector.broadcast %111 : vector<1x32xf32> to vector<8x32xf32>
    %133 = arith.addf %131, %132 : vector<8x32xf32>
    %c0_45 = arith.constant 0 : index
    %c0_46 = arith.constant 0 : index
    %134 = vector.load %arg12[%c0_45, %c0_46] : memref<8x32xf32, #tpu.memory_space<vmem>>, vector<8x32xf32>
    tpu.vector_store %arg12[%c0_45, %c0_46], %133 {strides = array<i32>} : memref<8x32xf32, #tpu.memory_space<vmem>>, vector<8x32xf32>,
    %c1_i32 = arith.constant 1 : i32
    %135 = arith.cmpi eq, %arg1, %c1_i32 : i32
    %136 = arith.extui %135 : i1 to i32
    %c0_i32_47 = arith.constant 0 : i32
    %137 = arith.cmpi ne, %136, %c0_i32_47 : i32
    scf.if %137 {
      %138 = arith.truncf %133 : vector<8x32xf32> to vector<8x32xbf16>
      %c0_48 = arith.constant 0 : index
      %c0_49 = arith.constant 0 : index
      %139 = vector.load %arg10[%c0_48, %c0_49] : memref<32x128xbf16, #tpu.memory_space<vmem>>, vector<32x128xbf16>
      %cst_50 = arith.constant dense<0.000000e+00> : vector<8x128xf32>
      %140 = tpu.matmul %138, %139, %cst_50 {dimension_numbers = #tpu.dot_dimension_numbers<[1], [0], [0], [1], [0, 0, 1, 1], [], []>} : vector<8x32xbf16>, vector<32x128xbf16>, vector<8x128xf32> -> vector<8x128xf32>
      %141 = vector.extract_strided_slice %0 {offsets = [2, 0], sizes = [1, 128], strides = [1, 1]} : vector<3x128xf32> to vector<1x128xf32>
      %142 = vector.broadcast %141 : vector<1x128xf32> to vector<8x128xf32>
      %143 = arith.addf %140, %142 : vector<8x128xf32>
      %c0_51 = arith.constant 0 : index
      %c0_52 = arith.constant 0 : index
      %c0_53 = arith.constant 0 : index
      %144 = vector.load %arg11[%c0_51, %c0_52, %c0_53] : memref<1x8x128xf32, #tpu.memory_space<vmem>>, vector<1x8x128xf32>
      %145 = vector.shape_cast %144 : vector<1x8x128xf32> to vector<8x128xf32>
      %146 = vector.shape_cast %143 : vector<8x128xf32> to vector<1x8x128xf32>
      tpu.vector_store %arg11[%c0_51, %c0_52, %c0_53], %146 {strides = array<i32>} : memref<1x8x128xf32, #tpu.memory_space<vmem>>, vector<1x8x128xf32>,
    } else {
    }
    return
  }
  func.func @transform_0(%arg0: i32, %arg1: i32) -> (i32, i32, i32) {
    %c0_i32 = arith.constant 0 : i32
    %c0_i32_0 = arith.constant 0 : i32
    %c0_i32_1 = arith.constant 0 : i32
    return %arg0, %c0_i32, %c0_i32_0 : i32, i32, i32
  }
  func.func @transform_1(%arg0: i32, %arg1: i32) -> (i32, i32, i32) {
    %c0_i32 = arith.constant 0 : i32
    %c0_i32_0 = arith.constant 0 : i32
    %c0_i32_1 = arith.constant 0 : i32
    return %arg0, %c0_i32, %c0_i32_0 : i32, i32, i32
  }
  func.func @transform_2(%arg0: i32, %arg1: i32) -> (i32, i32) {
    %c0_i32 = arith.constant 0 : i32
    %c0_i32_0 = arith.constant 0 : i32
    %c0_i32_1 = arith.constant 0 : i32
    return %c0_i32, %c0_i32_0 : i32, i32
  }
  func.func @transform_3(%arg0: i32, %arg1: i32) -> (i32, i32, i32) {
    %c0_i32 = arith.constant 0 : i32
    %c0_i32_0 = arith.constant 0 : i32
    %c0_i32_1 = arith.constant 0 : i32
    return %arg1, %c0_i32, %c0_i32_0 : i32, i32, i32
  }
  func.func @transform_4(%arg0: i32, %arg1: i32) -> (i32, i32, i32) {
    %c0_i32 = arith.constant 0 : i32
    %c0_i32_0 = arith.constant 0 : i32
    %c0_i32_1 = arith.constant 0 : i32
    return %arg1, %c0_i32, %c0_i32_0 : i32, i32, i32
  }
  func.func @transform_5(%arg0: i32, %arg1: i32) -> (i32, i32, i32) {
    %c0_i32 = arith.constant 0 : i32
    %c0_i32_0 = arith.constant 0 : i32
    %c0_i32_1 = arith.constant 0 : i32
    return %arg1, %c0_i32, %c0_i32_0 : i32, i32, i32
  }
  func.func @transform_6(%arg0: i32, %arg1: i32) -> (i32, i32, i32) {
    %c0_i32 = arith.constant 0 : i32
    %c0_i32_0 = arith.constant 0 : i32
    %c0_i32_1 = arith.constant 0 : i32
    return %arg1, %c0_i32, %c0_i32_0 : i32, i32, i32
  }
  func.func @transform_7(%arg0: i32, %arg1: i32) -> (i32, i32, i32) {
    %c0_i32 = arith.constant 0 : i32
    %c0_i32_0 = arith.constant 0 : i32
    %c0_i32_1 = arith.constant 0 : i32
    return %arg1, %c0_i32, %c0_i32_0 : i32, i32, i32
  }
  func.func @transform_8(%arg0: i32, %arg1: i32) -> (i32, i32) {
    %c0_i32 = arith.constant 0 : i32
    %c0_i32_0 = arith.constant 0 : i32
    %c0_i32_1 = arith.constant 0 : i32
    return %c0_i32, %c0_i32_0 : i32, i32
  }
  func.func @transform_9(%arg0: i32, %arg1: i32) -> (i32, i32, i32) {
    %c0_i32 = arith.constant 0 : i32
    %c0_i32_0 = arith.constant 0 : i32
    %c0_i32_1 = arith.constant 0 : i32
    return %arg0, %c0_i32, %c0_i32_0 : i32, i32, i32
  }
}

</mosaic_0001>

<bundles_post_ra>
// kernel: transformer_classifier_forward.1
= control target key start
LH: loop header
LB: loop body
LE: loop exit
PB: predicated region body
PF: predicated region fallthrough
CT: control target
= control target key end

     0   :  { %s4301_s0 = inlined_call_operand.hbm [shape: f32[2,8,32], index: 0, kind: input, shape index: {}]   ;;  %s4302_s1 = inlined_call_operand.hbm [shape: f32[2,1,8], index: 1, kind: input, shape index: {}]   ;;  %s4303_s2 = inlined_call_operand.hbm [shape: f32[3,128], index: 2, kind: input, shape index: {}]   ;;  %s4304_s3 = inlined_call_operand.hbm [shape: bf16[2,32,96], index: 3, kind: input, shape index: {}]   ;;  %s4305_s4 = inlined_call_operand.hbm [shape: bf16[2,32,32], index: 4, kind: input, shape index: {}]   ;;  %s4306_s5 = inlined_call_operand.hbm [shape: bf16[2,32,128], index: 5, kind: input, shape index: {}]   ;;  %s4307_s6 = inlined_call_operand.hbm [shape: bf16[2,128,32], index: 6, kind: input, shape index: {}]   ;;  %s4308_s7 = inlined_call_operand.hbm [shape: f32[2,8,128], index: 7, kind: input, shape index: {}]   ;;  %s4309_s8 = inlined_call_operand.hbm [shape: bf16[32,128], index: 8, kind: input, shape index: {}]   ;;  %s4310_s9 = inlined_call_operand.hbm [shape: f32[2,8,128], index: 9, kind: output, shape index: {}]  }
   0x1   :  { %4342 = sst [smem:[#allocation39_spill]] %s4301_s0 }
   0x2   :  { %4343 = sst [smem:[#allocation40_spill]] %s4303_s2 }
   0x3   :  { %4344 = sst [smem:[#allocation41_spill]] %s4304_s3 }
   0x4   :  { %4345 = sst [smem:[#allocation42_spill]] %s4305_s4 }
   0x5   :  { %4346 = sst [smem:[#allocation43_spill]] %s4306_s5 }
   0x6   :  { %4347 = sst [smem:[#allocation44_spill]] %s4307_s6 }
   0x7   :  { %4348 = sst [smem:[#allocation45_spill]] %s4308_s7 }
   0x8   :  { %4349 = sst [smem:[#allocation46_spill]] %s4309_s8 }
   0x9   :  { %4350 = sst [smem:[#allocation47_spill]] %s4310_s9 }
   0xa   :  { %14 = vsyncpa [#allocation4], 0 }
   0xb   :  { %16 = vsyncpa [#allocation4 + $0x1], 0 }
   0xc   :  { %17 = vsyncpa [#allocation7], 0 }
   0xd   :  { %19 = vsyncpa [#allocation7 + $0x1], 0 }
   0xe   :  { %20 = vsyncpa [#allocation10], 0 }
   0xf   :  { %22 = vsyncpa [#allocation10 + $0x1], 0 }
  0x10   :  { %23 = vsyncpa [#allocation13], 0 }
  0x11   :  { %25 = vsyncpa [#allocation13 + $0x1], 0 }
  0x12   :  { %26 = vsyncpa [#allocation16], 0 }
  0x13   :  { %28 = vsyncpa [#allocation16 + $0x1], 0 }
  0x14   :  { %29 = vsyncpa [#allocation5], 0 }
  0x15   :  { %31 = vsyncpa [#allocation5 + $0x1], 0  ;;  %s3460_s30 = smov 0   ;;  %s3462_s10 = smov 0  }
  0x16   :  { %s3464_s11 = smov 0   ;;  %s3466_s12 = smov 0  }
  0x17   :  { %s3468_s13 = smov 0   ;;  %s3470_s14 = smov 0  }
  0x18   :  { %s3472_s15 = smov 0   ;;  %s3474_s16 = smov 0  }
  0x19   :  { %s3476_s17 = smov 0   ;;  %s3478_s18 = smov 0  }
  0x1a   :  { %s3480_s19 = smov 0  }
  0x1b LB: > { %4351 = sst [smem:[#allocation27_spill]] %s3346_s10  ;;  %s3514_s20 = sadd.s32 4294967295, %s3382_s19   ;;  %s3382_s19 = sphi %s3480_s19, %s37_s19   ;;  %s3378_s18 = sphi %s3478_s18, %s4428_s18   ;;  %s3374_s17 = sphi %s3476_s17, %s4427_s17   ;;  %s3370_s16 = sphi %s3474_s16, %s4426_s16   ;;  %s3366_s15 = sphi %s3472_s15, %s4425_s15   ;;  %s3362_s14 = sphi %s3470_s14, %s4420_s14   ;;  %s3358_s13 = sphi %s3468_s13, %s4424_s13   ;;  %s3354_s12 = sphi %s3466_s12, %s4423_s12   ;;  %s3350_s11 = sphi %s3464_s11, %s4418_s11   ;;  %s3346_s10 = sphi %s3462_s10, %s4417_s10   ;;  %s3342_s30 = sphi %s3460_s30, %s4416_s30  }
  0x1c   : > { %4352 = sst [smem:[#allocation28_spill]] %s3350_s11  ;;  %p4315_p0 = scmp.eq.s32.totalorder %s3382_s19, 0 }
  0x1d   : > { %4353 = sst [smem:[#allocation29_spill]] %s3362_s14  ;;  %p4314_p1 = scmp.eq.s32.totalorder %s3514_s20, 0 }
  0x1e   : > { %4354 = sst [smem:[#allocation30_spill]] %s3366_s15  ;;  %p136_p2 = scmp.ne.s32.totalorder %s3350_s11, %s3346_s10 }
  0x1f   : > { %4355 = sst [smem:[#allocation31_spill]] %s3370_s16  ;;  %p142_p3 = scmp.ne.s32.totalorder %s3346_s10, %s3342_s30 }
  0x20   : > { %p2545_p5 = scmp.ge.s32.totalorder %s3382_s19, 1  ;;  %p3526_p6 = por %p136_p2, %p4315_p0 }
  0x21   : > { %p3532_p7 = por %p142_p3, %p4314_p1  ;;  %p304_p8 = scmp.lt.s32.totalorder %s3382_s19, 5 }
  0x22   : > { %s4356_s22 = scalar_select %p3526_p6, 1, 0 }
  0x23   : > { %s4357_s23 = scalar_select %p3532_p7, 1, 0 }
  0x24   : > { %p3537_p9 = pnand %p2545_p5, %p304_p8  ;;  %s3384_s25 = smov [#allocation8]  }
  0x25   : > { %4358 = sst [smem:[#allocation32_spill]] %s4357_s23  ;;  %s317_s26 = sshll.u32 %s3384_s25, 4  ;;  %s318_s26 = int_to_ptr.vmem [resolvable:$true] %s317_s26 }
  0x26   : > { %s4359_s24 = scalar_select %p3537_p9, 1, 0 }
  0x27   : > { %p2784_p10 = pneg %p3537_p9  ;;  %s3385_s27 = smov [#allocation17]  }
  0x28   : > { %4360 = sst [smem:[#allocation33_spill]] %s4359_s24  ;;  %s327_s28 = sshll.u32 %s3385_s27, 4  ;;  %s3543_s28 = int_to_ptr.vmem [resolvable:$true] %s327_s28 }
  0x29   : > { %p3547_p11 = pnand %p2784_p10, %p4314_p1  ;;  %s4362_s2 = sld [smem:[#allocation40_spill]] }
  0x2b   : > { %p2972_p2 = pneg %p3547_p11 }
  0x2f   : > { %s2970_s9 = scalar_lea.hbm %s4362_s2, 64 }
  0x30   : > { %p2971_p13 = scmp.ne.s32.totalorder %s4362_s2, %s2970_s9  ;;  %p2977_p8 = scmp.lt.u32.totalorder %s2970_s9, %s4362_s2 }
  0x32   : > { %p2973_p3 = pnand %p2972_p2, %p2971_p13 }
  0x34   : > { %p2974_p5 = pneg %p2973_p3 }
  0x36   : > { %p2979_p10 = pnand %p2977_p8, %p2974_p5 }
  0x38   : > { %2982 = shalt.err (!%p2979_p10)
}
  0x39   : > { %s2983_s23 = scalar_lea.vmem %s318_s26, 64  ;;  %p2991_p12 = scmp.lt.s32.totalorder %s318_s26, %s318_s26 }
  0x3a   : > { %p2984_p4 = scmp.ne.s32.totalorder %s318_s26, %s2983_s23  ;;  %p2992_p7 = scmp.lt.s32.totalorder %s2983_s23, %s2983_s23 }
  0x3c   : > { %p2986_p1 = pnand %p2984_p4, %p2972_p2  ;;  %p2993_p9 = por %p2992_p7, %p2991_p12 }
  0x3e   : > { %p2987_p0 = pneg %p2986_p1 }
  0x40   : > { %p2994_p6 = pnand %p2993_p9, %p2987_p0 }
  0x42   : > { %2997 = shalt.err (!%p2994_p6)
}
  0x43   : > { %2787 = dma.hbm_to_vmem [thread:$0]  (!%p3547_p11), %s4362_s2, 64, %s318_s26, [#allocation7]  }
  0x44   : > { %s4363_s8 = sld [smem:[#allocation46_spill]] }
  0x4a   : > { %s2998_s30 = scalar_lea.hbm %s4363_s8, 256 }
  0x4b   : > { %p2999_p1 = scmp.ne.s32.totalorder %s4363_s8, %s2998_s30  ;;  %p3005_p6 = scmp.lt.u32.totalorder %s2998_s30, %s4363_s8 }
  0x4d   : > { %p3001_p4 = pnand %p2999_p1, %p2972_p2 }
  0x4f   : > { %p3002_p0 = pneg %p3001_p4 }
  0x51   : > { %p3007_p7 = pnand %p3005_p6, %p3002_p0 }
  0x53   : > { %3010 = shalt.err (!%p3007_p7)
}
  0x54   : > { %s3011_s26 = scalar_lea.vmem %s3543_s28, 256  ;;  %p3019_p3 = scmp.lt.s32.totalorder %s3543_s28, %s3543_s28 }
  0x55   : > { %p3012_p9 = scmp.ne.s32.totalorder %s3543_s28, %s3011_s26  ;;  %p3020_p5 = scmp.lt.s32.totalorder %s3011_s26, %s3011_s26 }
  0x57   : > { %p3014_p12 = pnand %p3012_p9, %p2972_p2  ;;  %p3021_p8 = por %p3020_p5, %p3019_p3 }
  0x59   : > { %p3015_p13 = pneg %p3014_p12 }
  0x5b   : > { %p3022_p10 = pnand %p3021_p8, %p3015_p13 }
  0x5d   : > { %3025 = shalt.err (!%p3022_p10)
}
  0x5e   : > { %s4319_s10 = smov 64   ;;  %s4321_s16 = smov 4  }
  0x5f   : > { %2790 = dma.hbm_to_vmem [thread:$0]  (!%p3547_p11), %s4363_s8, 256, %s3543_s28, [#allocation16], %s4319_s10, %s4319_s10, %s4321_s16  }
  0x60   : > { %s3603_s15 = sand.u32 1, %s3382_s19   ;;  %s3606_s30 = sand.u32 1, %s3350_s11  }
  0x61   : > { %4364 = sst [smem:[#allocation34_spill]] %s3606_s30  ;;  %s3609_s25 = sshll.u32 %s3606_s30, 4 }
  0x62   : > { %s3612_s27 = sshll.u32 %s3374_s17, 8  ;;  %s4365_s3 = sld [smem:[#allocation41_spill]] }
  0x63   : > { %s380_s28 = scalar_lea.vmem [#allocation9], %s3609_s25  ;;  %p4366_p11 = scmp.ne.s32.totalorder %s4356_s22, 0 }
  0x64   : > { %s387_s21 = sshll.u32 %s380_s28, 4  ;;  %p4367_p2 = scmp.lt.s32.totalorder %s3382_s19, 4  ;;  %s3621_s21 = int_to_ptr.vmem [resolvable:$true] %s387_s21 }
  0x65   : > { %s4369_s5 = sld [smem:[#allocation43_spill]] }
  0x66   : > { %p3627_p1 = pnand %p4367_p2, %p4366_p11 }
  0x68   : > { %s3618_s26 = scalar_lea.hbm %s4365_s3, %s3612_s27  ;;  %p3642_p0 = pneg %p3627_p1 }
  0x69   : > { %s4368_s9 = scalar_select %p3627_p1, 1, 0 }
  0x6a   : > { %s3026_s2 = scalar_lea.hbm %s3618_s26, 256  ;;  %s3031_s24 = scalar_lea.hbm %s4365_s3, 512 }
  0x6b   : > { %s3635_s29 = scalar_lea.hbm %s4369_s5, %s3612_s27  ;;  %p3027_p4 = scmp.ne.s32.totalorder %s3618_s26, %s3026_s2 }
  0x6c   : > { %s4370_s28 = scalar_select %p3642_p0, 1, 0 }
  0x6d   : > { %p3029_p6 = pnand %p3642_p0, %p3027_p4  ;;  %p3032_p9 = scmp.lt.u32.totalorder %s3618_s26, %s4365_s3 }
  0x6e   : > { %p3033_p12 = scmp.lt.u32.totalorder %s3031_s24, %s3026_s2  ;;  %p3035_p3 = scmp.lt.u32.totalorder %s3026_s2, %s3618_s26 }
  0x6f   : > { %p3030_p7 = pneg %p3029_p6 }
  0x70   : > { %p3034_p13 = por %p3033_p12, %p3032_p9 }
  0x72   : > { %p3036_p5 = por %p3035_p3, %p3034_p13 }
  0x74   : > { %p3037_p8 = pnand %p3036_p5, %p3030_p7 }
  0x76   : > { %3040 = shalt.err (!%p3037_p8)
}
  0x77   : > { %s3041_s23 = scalar_lea.vmem %s3621_s21, 256  ;;  %s3388_s8 = smov [#allocation9]  }
  0x78   : > { %p3042_p10 = scmp.ne.s32.totalorder %s3621_s21, %s3041_s23  ;;  %s3046_s22 = sshll.u32 %s3388_s8, 4  ;;  %s3047_s22 = int_to_ptr.vmem [resolvable:$false] %s3046_s22 }
  0x79   : > { %s3048_s10 = scalar_lea.vmem %s3047_s22, 512  ;;  %p3049_p4 = scmp.lt.s32.totalorder %s3621_s21, %s3047_s22 }
  0x7a   : > { %p3044_p11 = pnand %p3042_p10, %p3642_p0  ;;  %p3050_p6 = scmp.lt.s32.totalorder %s3048_s10, %s3041_s23 }
  0x7c   : > { %p3045_p2 = pneg %p3044_p11  ;;  %p3051_p9 = por %p3050_p6, %p3049_p4 }
  0x7e   : > { %p3052_p12 = pnand %p3051_p9, %p3045_p2 }
  0x80   : > { %3055 = shalt.err (!%p3052_p12)
}
  0x81   : > { %s4371_s2 = smov 4   ;;  %s4372_s24 = smov 64  }
  0x82   : > { %s4373_s16 = scalar_lea.sflag [#allocation10], %s3603_s15  ;;  %s422_s23 = scalar_lea.vmem [#allocation12], %s3609_s25 }
  0x83   : > { %2800 = dma.hbm_to_vmem [thread:$0]  (!%p3627_p1), %s3618_s26, 256, %s3621_s21, %s4373_s16, %s4372_s24, %s4372_s24, %s4371_s2  }
  0x84   : > { %s429_s8 = sshll.u32 %s422_s23, 4  ;;  %s4329_s22 = scalar_lea.sflag [#allocation13], %s3603_s15  ;;  %s3671_s8 = int_to_ptr.vmem [resolvable:$true] %s429_s8 }
  0x85   : > { %s3056_s10 = scalar_lea.hbm %s3635_s29, 256  ;;  %s3061_s6 = scalar_lea.hbm %s4369_s5, 512 }
  0x86   : > { %p3057_p7 = scmp.ne.s32.totalorder %s3635_s29, %s3056_s10  ;;  %p3062_p5 = scmp.lt.u32.totalorder %s3635_s29, %s4369_s5 }
  0x87   : > { %p3063_p8 = scmp.lt.u32.totalorder %s3061_s6, %s3056_s10  ;;  %p3065_p11 = scmp.lt.u32.totalorder %s3056_s10, %s3635_s29 }
  0x88   : > { %p3059_p13 = pnand %p3057_p7, %p3642_p0 }
  0x89   : > { %p3064_p10 = por %p3063_p8, %p3062_p5 }
  0x8a   : > { %p3060_p3 = pneg %p3059_p13 }
  0x8b   : > { %p3066_p2 = por %p3065_p11, %p3064_p10 }
  0x8d   : > { %p3067_p4 = pnand %p3066_p2, %p3060_p3 }
  0x8f   : > { %3070 = shalt.err (!%p3067_p4)
}
  0x90   : > { %s3071_s26 = scalar_lea.vmem %s3671_s8, 256  ;;  %s3389_s3 = smov [#allocation12]  }
  0x91   : > { %p3072_p6 = scmp.ne.s32.totalorder %s3671_s8, %s3071_s26  ;;  %s3076_s7 = sshll.u32 %s3389_s3, 4  ;;  %s3077_s7 = int_to_ptr.vmem [resolvable:$false] %s3076_s7 }
  0x92   : > { %s3078_s4 = scalar_lea.vmem %s3077_s7, 512  ;;  %p3079_p7 = scmp.lt.s32.totalorder %s3671_s8, %s3077_s7 }
  0x93   : > { %p3074_p9 = pnand %p3072_p6, %p3642_p0  ;;  %p3080_p13 = scmp.lt.s32.totalorder %s3078_s4, %s3071_s26 }
  0x95   : > { %p3075_p12 = pneg %p3074_p9  ;;  %p3081_p5 = por %p3080_p13, %p3079_p7 }
  0x97   : > { %p3082_p8 = pnand %p3081_p5, %p3075_p12 }
  0x99   : > { %3085 = shalt.err (!%p3082_p8)
}
  0x9a   : > { %2806 = dma.hbm_to_vmem [thread:$0]  (!%p3627_p1), %s3635_s29, 256, %s3671_s8, %s4329_s22, %s4372_s24, %s4372_s24, %s4371_s2  }
  0x9b   : > { %s2544_s6 = sadd.s32 4294967294, %s3382_s19   ;;  %s46_s30 = sadd.s32 1, %s3374_s17 }
  0x9c   : > { %p47_p3 = scmp.ge.s32.totalorder %s46_s30, 2  ;;  %s49_s21 = sadd.s32 1, %s3378_s18 }
  0x9d   : > { %s56_s16 = sadd.s32 1, %s3362_s14  ;;  %p63_p10 = scmp.ne.s32.totalorder %s3362_s14, %s3358_s13 }
  0x9e   : > { %s4430_s30 = smov (%p47_p3, %s46_s30), 0  ;;  %s4432_s21 = smov (!%p47_p3, %s49_s21), %s3378_s18 }
  0x9f   : > { %4374 = sst [smem:[#allocation35_spill]] %s4430_s30  ;;  %p4375_p11 = scmp.eq.s32.totalorder %s3382_s19, 0 }
  0xa0   : > { %p69_p4 = scmp.ne.s32.totalorder %s3358_s13, %s3354_s12  ;;  %p51_p6 = scmp.ge.s32.totalorder %s4432_s21, 2 }
  0xa1   : > { %p3711_p2 = por %p4375_p11, %p63_p10  ;;  %s126_s23 = ssub.s32 %s3374_s17, %s4430_s30 }
  0xa2   : > { %p4377_p9 = scmp.eq.s32.totalorder %s3514_s20, 0  ;;  %p127_p7 = scmp.eq.s32.totalorder %s126_s23, 0 }
  0xa3   : > { %s4434_s21 = smov (%p51_p6, %s4432_s21), 0  ;;  %s4380_s10 = sadd.s32 1, %s3350_s11 }
  0xa4   : > { %p3724_p12 = por %p4377_p9, %p69_p4  ;;  %4379 = sst [smem:[#allocation36_spill]] %s4434_s21 }
  0xa5   : > { %s3733_s26 = scalar_select %p127_p7, %s3350_s11, %s4380_s10  }
  0xa6   : > { %s4378_s8 = scalar_select %p3724_p12, 1, 0 }
  0xa7   : > { %4381 = sst [smem:[#allocation37_spill]] %s3733_s26  ;;  %s53_s3 = ssub.s32 %s3378_s18, %s4434_s21 }
  0xa8   : > { %p4382_p13 = scmp.eq.s32.totalorder %s3514_s20, 3  ;;  %p54_p8 = scmp.eq.s32.totalorder %s53_s3, 0 }
  0xa9   : > { %p297_p3 = scmp.eq.s32.totalorder %s2544_s6, 3  ;;  %s3744_s4 = sand.u32 1, %s3362_s14  }
  0xaa   : > { %p3739_p5 = por %p4382_p13, %p63_p10  ;;  %s2550_s22 = sshll.u32 %s3378_s18, 7 }
  0xab   : > { %s3748_s23 = scalar_select %p54_p8, %s3362_s14, %s56_s16  }
  0xac   : > { %s4383_s7 = scalar_select %p3739_p5, 1, 0 }
  0xad   : > { %4384 = sst [smem:[#allocation38_spill]] %s3748_s23  ;;  %p3753_p11 = por %p297_p3, %p69_p4 }
  0xae   : > { %s2549_s10 = sshll.u32 %s3744_s4, 3  ;;  %s4386_s0 = sld [smem:[#allocation39_spill]] }
  0xaf   : > { %s4385_s5 = scalar_select %p3753_p11, 1, 0 }
  0xb0   : > { %p4387_p10 = scmp.lt.s32.totalorder %s3382_s19, 4  ;;  %s345_s16 = scalar_lea.vmem [#allocation3], %s2549_s10 }
  0xb1   : > { %s352_s3 = sshll.u32 %s345_s16, 4  ;;  %s342_s23 = scalar_lea.sflag [#allocation4], %s3744_s4  ;;  %s3771_s3 = int_to_ptr.vmem [resolvable:$true] %s352_s3 }
  0xb2   : > { %p3767_p6 = pnand %p4387_p10, %p3711_p2 }
  0xb4   : > { %s3761_s26 = scalar_lea.hbm %s4386_s0, %s2550_s22  ;;  %p3088_p9 = pneg %p3767_p6 }
  0xb5   : > { %s3086_s30 = scalar_lea.hbm %s3761_s26, 128  ;;  %s3091_s29 = scalar_lea.hbm %s4386_s0, 256 }
  0xb6   : > { %p3087_p4 = scmp.ne.s32.totalorder %s3761_s26, %s3086_s30  ;;  %p3092_p2 = scmp.lt.u32.totalorder %s3761_s26, %s4386_s0 }
  0xb7   : > { %p3093_p8 = scmp.lt.u32.totalorder %s3091_s29, %s3086_s30  ;;  %p3095_p10 = scmp.lt.u32.totalorder %s3086_s30, %s3761_s26 }
  0xb8   : > { %p3089_p7 = pnand %p3088_p9, %p3087_p4 }
  0xb9   : > { %p3094_p3 = por %p3093_p8, %p3092_p2 }
  0xba   : > { %p3090_p13 = pneg %p3089_p7 }
  0xbb   : > { %p3096_p11 = por %p3095_p10, %p3094_p3 }
  0xbd   : > { %p3097_p5 = pnand %p3096_p11, %p3090_p13 }
  0xbf   : > { %3100 = shalt.err (!%p3097_p5)
}
  0xc0   : > { %s3101_s10 = scalar_lea.vmem %s3771_s3, 128  ;;  %s3390_s16 = smov [#allocation3]  }
  0xc1   : > { %p3102_p4 = scmp.ne.s32.totalorder %s3771_s3, %s3101_s10  ;;  %s3106_s22 = sshll.u32 %s3390_s16, 4  ;;  %s3107_s22 = int_to_ptr.vmem [resolvable:$false] %s3106_s22 }
  0xc2   : > { %s3108_s11 = scalar_lea.vmem %s3107_s22, 256  ;;  %p3109_p1 = scmp.lt.s32.totalorder %s3771_s3, %s3107_s22 }
  0xc3   : > { %p3104_p7 = pnand %p3102_p4, %p3088_p9  ;;  %p3110_p2 = scmp.lt.s32.totalorder %s3108_s11, %s3101_s10 }
  0xc5   : > { %p3105_p12 = pneg %p3104_p7  ;;  %p3111_p8 = por %p3110_p2, %p3109_p1 }
  0xc7   : > { %p3112_p3 = pnand %p3111_p8, %p3105_p12 }
  0xc9   : > { %3115 = shalt.err (!%p3112_p3)
}
  0xca   : > { %2794 = dma.hbm_to_vmem [thread:$0]  (!%p3767_p6), %s3761_s26, 128, %s3771_s3, %s342_s23  }
  0xcb   : > { %s2551_s14 = sshll.u32 %s3378_s18, 4  ;;  %s362_s10 = scalar_lea.vmem [#allocation6], %s3744_s4 }
  0xcc   : > { %s3803_s29 = scalar_lea.hbm %s4302_s1, %s2551_s14  ;;  %s369_s16 = sshll.u32 %s362_s10, 4  ;;  %s370_s16 = int_to_ptr.vmem [resolvable:$true] %s369_s16 }
  0xcd   : > { %s360_s22 = scalar_lea.sflag [#allocation7], %s3603_s15  ;;  %s3116_s11 = scalar_lea.hbm %s3803_s29, 16 }
  0xce   : > { %p3117_p1 = scmp.ne.s32.totalorder %s3803_s29, %s3116_s11  ;;  %s3121_s3 = scalar_lea.hbm %s4302_s1, 32 }
  0xcf   : > { %p3122_p11 = scmp.lt.u32.totalorder %s3803_s29, %s4302_s1  ;;  %p3123_p13 = scmp.lt.u32.totalorder %s3121_s3, %s3116_s11 }
  0xd0   : > { %p3119_p12 = pnand %p3117_p1, %p3088_p9  ;;  %p3125_p4 = scmp.lt.u32.totalorder %s3116_s11, %s3803_s29 }
  0xd1   : > { %p3124_p10 = por %p3123_p13, %p3122_p11 }
  0xd2   : > { %p3120_p5 = pneg %p3119_p12 }
  0xd3   : > { %p3126_p7 = por %p3125_p4, %p3124_p10 }
  0xd5   : > { %p3127_p2 = pnand %p3126_p7, %p3120_p5 }
  0xd7   : > { %3130 = shalt.err (!%p3127_p2)
}
  0xd8   : > { %s3131_s4 = scalar_lea.vmem %s370_s16, 16  ;;  %s3391_s21 = smov [#allocation6]  }
  0xd9   : > { %p3132_p8 = scmp.ne.s32.totalorder %s370_s16, %s3131_s4  ;;  %s3136_s10 = sshll.u32 %s3391_s21, 4  ;;  %s3137_s10 = int_to_ptr.vmem [resolvable:$false] %s3136_s10 }
  0xda   : > { %s3138_s26 = scalar_lea.vmem %s3137_s10, 32  ;;  %p3139_p12 = scmp.lt.s32.totalorder %s370_s16, %s3137_s10 }
  0xdb   : > { %p3134_p3 = pnand %p3132_p8, %p3088_p9  ;;  %p3140_p0 = scmp.lt.s32.totalorder %s3138_s26, %s3131_s4 }
  0xdd   : > { %p3135_p1 = pneg %p3134_p3  ;;  %p3141_p11 = por %p3140_p0, %p3139_p12 }
  0xdf   : > { %p3142_p13 = pnand %p3141_p11, %p3135_p1 }
  0xe1   : > { %3145 = shalt.err (!%p3142_p13)
}
  0xe2   : > { %s4389_s11 = sld [smem:[#allocation34_spill]]  ;;  %s4390_s14 = sld [smem:[#allocation42_spill]] }
  0xe3   : > { %2797 = dma.hbm_to_vmem [thread:$0]  (!%p3767_p6), %s3803_s29, 16, %s370_s16, %s360_s22  }
  0xe4   : > { %s401_s4 = scalar_lea.vmem [#allocation11], %s3609_s25  ;;  %p4392_p9 = scmp.ne.s32.totalorder %s4370_s28, 0 }
  0xe5   : > { %s408_s21 = sshll.u32 %s401_s4, 4  ;;  %s3833_s21 = int_to_ptr.vmem [resolvable:$true] %s408_s21 }
  0xe8   : > { %s4391_s0 = smov %s4390_s14  ;;  %s3830_s30 = scalar_lea.hbm %s4390_s14, %s3612_s27 }
  0xe9   : > { %s2561_s6 = sshll.u32 %s4389_s11, 6  ;;  %s3146_s10 = scalar_lea.hbm %s3830_s30, 256 }
  0xea   : > { %p3147_p0 = scmp.ne.s32.totalorder %s3830_s30, %s3146_s10  ;;  %s3151_s22 = scalar_lea.hbm %s4391_s0, 512 }
  0xeb   : > { %p3152_p6 = scmp.lt.u32.totalorder %s3830_s30, %s4391_s0  ;;  %p3153_p4 = scmp.lt.u32.totalorder %s3151_s22, %s3146_s10 }
  0xec   : > { %p3149_p5 = pnand %p3147_p0, %p4392_p9  ;;  %p3155_p2 = scmp.lt.u32.totalorder %s3146_s10, %s3830_s30 }
  0xed   : > { %p3154_p7 = por %p3153_p4, %p3152_p6 }
  0xee   : > { %p3150_p10 = pneg %p3149_p5 }
  0xef   : > { %p3156_p8 = por %p3155_p2, %p3154_p7 }
  0xf1   : > { %p3157_p3 = pnand %p3156_p8, %p3150_p10 }
  0xf3   : > { %3160 = shalt.err (!%p3157_p3)
}
  0xf4   : > { %s3161_s25 = scalar_lea.vmem %s3833_s21, 256  ;;  %s3392_s23 = smov [#allocation11]  }
  0xf5   : > { %p3162_p1 = scmp.ne.s32.totalorder %s3833_s21, %s3161_s25  ;;  %s3166_s3 = sshll.u32 %s3392_s23, 4  ;;  %s3167_s3 = int_to_ptr.vmem [resolvable:$false] %s3166_s3 }
  0xf6   : > { %s3168_s14 = scalar_lea.vmem %s3167_s3, 512  ;;  %p3169_p13 = scmp.lt.s32.totalorder %s3833_s21, %s3167_s3 }
  0xf7   : > { %p3164_p12 = pnand %p3162_p1, %p4392_p9  ;;  %p3170_p0 = scmp.lt.s32.totalorder %s3168_s14, %s3161_s25 }
  0xf9   : > { %p3165_p11 = pneg %p3164_p12  ;;  %p3171_p5 = por %p3170_p0, %p3169_p13 }
  0xfb   : > { %p3172_p6 = pnand %p3171_p5, %p3165_p11 }
  0xfd   : > { %3175 = shalt.err (!%p3172_p6)
}
  0xfe   : > { %p4393_p10 = scmp.ne.s32.totalorder %s4368_s9, 0  ;;  %s4394_s4 = scalar_lea.sflag [#allocation10], %s3603_s15 }
  0xff   : > { %s2622_s10 = sshll.u32 %s3374_s17, 10  ;;  %s4395_s22 = sld [smem:[#allocation44_spill]] }
 0x100   : > { %2803 = dma.hbm_to_vmem [thread:$0]  (!%p4393_p10), %s3830_s30, 256, %s3833_s21, %s4394_s4, %s4372_s24, %s4372_s24, %s4371_s2  }
 0x101   : > { %s443_s26 = scalar_lea.vmem [#allocation14], %s2561_s6 }
 0x102   : > { %s450_s25 = sshll.u32 %s443_s26, 4  ;;  %s3870_s25 = int_to_ptr.vmem [resolvable:$true] %s450_s25 }
 0x105   : > { %s3866_s27 = scalar_lea.hbm %s4395_s22, %s2622_s10  ;;  %s3181_s3 = scalar_lea.hbm %s4395_s22, 2048 }
 0x106   : > { %s3176_s23 = scalar_lea.hbm %s3866_s27, 1024  ;;  %p3182_p8 = scmp.lt.u32.totalorder %s3866_s27, %s4395_s22 }
 0x107   : > { %p3177_p4 = scmp.ne.s32.totalorder %s3866_s27, %s3176_s23  ;;  %p3183_p3 = scmp.lt.u32.totalorder %s3181_s3, %s3176_s23 }
 0x108   : > { %p3185_p12 = scmp.lt.u32.totalorder %s3176_s23, %s3866_s27 }
 0x109   : > { %p3179_p7 = pnand %p3177_p4, %p4392_p9  ;;  %p3184_p1 = por %p3183_p3, %p3182_p8 }
 0x10b   : > { %p3180_p2 = pneg %p3179_p7  ;;  %p3186_p11 = por %p3185_p12, %p3184_p1 }
 0x10d   : > { %p3187_p13 = pnand %p3186_p11, %p3180_p2 }
 0x10f   : > { %3190 = shalt.err (!%p3187_p13)
}
 0x110   : > { %s3191_s6 = scalar_lea.vmem %s3870_s25, 1024  ;;  %s3393_s10 = smov [#allocation14]  }
 0x111   : > { %p3192_p0 = scmp.ne.s32.totalorder %s3870_s25, %s3191_s6  ;;  %s3196_s29 = sshll.u32 %s3393_s10, 4  ;;  %s3197_s29 = int_to_ptr.vmem [resolvable:$false] %s3196_s29 }
 0x112   : > { %s3198_s16 = scalar_lea.vmem %s3197_s29, 2048  ;;  %p3199_p4 = scmp.lt.s32.totalorder %s3870_s25, %s3197_s29 }
 0x113   : > { %p3194_p5 = pnand %p3192_p0, %p4392_p9  ;;  %p3200_p7 = scmp.lt.s32.totalorder %s3198_s16, %s3191_s6 }
 0x115   : > { %p3195_p6 = pneg %p3194_p5  ;;  %p3201_p8 = por %p3200_p7, %p3199_p4 }
 0x117   : > { %p3202_p3 = pnand %p3201_p8, %p3195_p6 }
 0x119   : > { %3205 = shalt.err (!%p3202_p3)
}
 0x11a   : > { %s4396_s26 = scalar_lea.sflag [#allocation13], %s3603_s15  ;;  %s2564_s23 = sshll.u32 %s4389_s11, 3 }
 0x11b   : > { %2809 = dma.hbm_to_vmem [thread:$0]  (!%p4393_p10), %s3866_s27, 1024, %s3870_s25, %s4396_s26, %s4372_s24, %s4372_s24, %s4371_s2  }
 0x11c   : > { %s2565_s30 = sshll.u32 %s3374_s17, 7  ;;  %s4397_s14 = sld [smem:[#allocation45_spill]] }
 0x11d   : > { %s464_s10 = scalar_lea.vmem [#allocation15], %s2564_s23  ;;  %s461_s16 = scalar_lea.sflag [#allocation16], %s3603_s15 }
 0x11e   : > { %s471_s29 = sshll.u32 %s464_s10, 4  ;;  %s472_s29 = int_to_ptr.vmem [resolvable:$true] %s471_s29 }
 0x122   : > { %s4398_s4 = smov %s4397_s14  ;;  %s3903_s6 = scalar_lea.hbm %s4397_s14, %s2565_s30 }
 0x123   : > { %s3206_s0 = scalar_lea.hbm %s3903_s6, 128  ;;  %s3211_s11 = scalar_lea.hbm %s4398_s4, 256 }
 0x124   : > { %p3207_p2 = scmp.ne.s32.totalorder %s3903_s6, %s3206_s0  ;;  %p3212_p11 = scmp.lt.u32.totalorder %s3903_s6, %s4398_s4 }
 0x125   : > { %p3213_p13 = scmp.lt.u32.totalorder %s3211_s11, %s3206_s0  ;;  %p3215_p5 = scmp.lt.u32.totalorder %s3206_s0, %s3903_s6 }
 0x126   : > { %p3209_p1 = pnand %p3207_p2, %p4392_p9 }
 0x127   : > { %p3214_p0 = por %p3213_p13, %p3212_p11 }
 0x128   : > { %p3210_p12 = pneg %p3209_p1 }
 0x129   : > { %p3216_p6 = por %p3215_p5, %p3214_p0 }
 0x12b   : > { %p3217_p4 = pnand %p3216_p6, %p3210_p12 }
 0x12d   : > { %3220 = shalt.err (!%p3217_p4)
}
 0x12e   : > { %s3221_s15 = scalar_lea.vmem %s472_s29, 128  ;;  %s3394_s26 = smov [#allocation15]  }
 0x12f   : > { %p3222_p7 = scmp.ne.s32.totalorder %s472_s29, %s3221_s15  ;;  %s3226_s23 = sshll.u32 %s3394_s26, 4  ;;  %s3227_s23 = int_to_ptr.vmem [resolvable:$false] %s3226_s23 }
 0x130   : > { %s3228_s30 = scalar_lea.vmem %s3227_s23, 256  ;;  %p3229_p2 = scmp.lt.s32.totalorder %s472_s29, %s3227_s23 }
 0x131   : > { %p3224_p8 = pnand %p3222_p7, %p4392_p9  ;;  %p3230_p1 = scmp.lt.s32.totalorder %s3228_s30, %s3221_s15 }
 0x133   : > { %p3225_p3 = pneg %p3224_p8  ;;  %p3231_p10 = por %p3230_p1, %p3229_p2 }
 0x135   : > { %p3232_p11 = pnand %p3231_p10, %p3225_p3 }
 0x137   : > { %3235 = shalt.err (!%p3232_p11)
}
 0x138   : > { %p4399_p13 = scmp.ne.s32.totalorder %s4368_s9, 0  ;;  %s4400_s0 = sld [smem:[#allocation33_spill]] }
 0x13a   : > { %2812 = dma.hbm_to_vmem [thread:$0]  (!%p4399_p13), %s3903_s6, 128, %s472_s29, %s461_s16  }
 0x13e   : > { %p4401_p12 = scmp.ne.s32.totalorder %s4400_s0, 0 }
 0x13f   : > { %s3926_s28 = sand.u32 (!%p4401_p12), 1, %s3358_s13   ;;  %p4402_p9 = scmp.ne.s32.totalorder (!%p4401_p12), %s4378_s8, 0 }
 0x140   : > { %480 = sbr.rel (%p4401_p12) target bundleno = 3743 (0xe9f), region = 56  ;;  %s2567_s21 = sshll.u32 (!%p4401_p12), %s3926_s28, 3 }
 0x141   : > { %s483_s3 = scalar_lea.sflag (!%p4401_p12), [#allocation4], %s3926_s28  ;;  %s3932_s14 = scalar_lea.vmem (!%p4401_p12), [#allocation3], %s2567_s21 }
 0x147   : > { %3309 = dma.done.wait (%p4402_p9), %s483_s3, 128  }
 0x148   : > { %3311 = vsyncadd (%p4402_p9), %s483_s3, 4294967168  ;;  %s491_s9 = sand.u32 1, %s3514_s20   ;;  %s494_s10 = scalar_lea.vmem [#allocation6], %s3926_s28 }
 0x149   : > { %s492_s6 = scalar_lea.sflag [#allocation7], %s491_s9 }
 0x14a   : > { %3313 = dma.done.wait (%p4402_p9), %s492_s6, 16  }
 0x14b   : > { %3315 = vsyncadd (%p4402_p9), %s492_s6, 4294967280  ;;  %p4403_p10 = scmp.eq.s32.totalorder %s3514_s20, 0 }
 0x14d   : > { %3317 = dma.done.wait (%p4403_p10), [#allocation7], 64   ;;  %p4404_p0 = pmov %p4403_p10 }
 0x14e   : > { %s4405_s29 = sld [smem:[#allocation27_spill]]  ;;  %s4406_s16 = sld [smem:[#allocation32_spill]] }
 0x14f   : > { %3319 = vsyncadd (%p4404_p0), [#allocation7], 4294967232  ;;  %s504_s11 = scalar_lea.sflag [#allocation10], %s491_s9 }
 0x154   : > { %s505_s2 = sand.u32 1, %s4405_s29   ;;  %p4407_p5 = scmp.ne.s32.totalorder %s4406_s16, 0 }
 0x155   : > { %s3949_s24 = sshll.u32 %s505_s2, 4 }
 0x156   : > { %s507_s27 = scalar_lea.vmem [#allocation9], %s3949_s24 }
 0x157   : > { %3321 = dma.done.wait (%p4407_p5), %s504_s11, 512  }
 0x158   : > { %3323 = vsyncadd (%p4407_p5), %s504_s11, 4294966784  ;;  %s516_s8 = scalar_lea.vmem [#allocation11], %s3949_s24  ;;  %s522_s25 = scalar_lea.sflag [#allocation13], %s491_s9 }
 0x159   : > { %s525_s15 = scalar_lea.vmem [#allocation12], %s3949_s24 }
 0x15a   : > { %3325 = dma.done.wait (%p4407_p5), %s522_s25, 1280  }
 0x15b   : > { %3327 = vsyncadd (%p4407_p5), %s522_s25, 4294966016  ;;  %s2572_s26 = sshll.u32 %s505_s2, 6  ;;  %s2573_s23 = sshll.u32 %s505_s2, 3 }
 0x15c   : > { %s3962_s30 = scalar_lea.vmem [#allocation14], %s2572_s26  ;;  %s540_s0 = scalar_lea.sflag [#allocation16], %s491_s9 }
 0x15d   : > { %s3964_s3 = scalar_lea.vmem [#allocation15], %s2573_s23 }
 0x15e   : > { %3329 = dma.done.wait (%p4407_p5), %s540_s0, 128  }
 0x15f   : > { %3331 = vsyncadd (%p4407_p5), %s540_s0, 4294967168  ;;  %p4408_p6 = pmov %p4404_p0 }
 0x160   : > { %p4409_p4 = pmov %p4404_p0 }
 0x161   : > { %3333 = dma.done.wait (%p4408_p6), [#allocation16], 256  }
 0x162   : > { %3335 = vsyncadd (%p4409_p4), [#allocation16], 4294967040  ;;  %v3974_v0 = vld [vmem:[#allocation8] sm:$0x7]  ;;  %s3978_s6 = scalar_lea.vmem [#allocation18], %s2567_s21  ;;  %s4410_s9 = sld [smem:[#allocation30_spill]] }
 0x168   : > { %p2576_p7 = scmp.ne.s32.totalorder %s4410_s9, 0 }
 0x169   : > { %v617_v1 = vld [vmem:[%s3932_s14] sm:$0xff] (!%p2576_p7)  ;;  %vm618_vm0 = vcmask (!%p2576_p7), 261120   ;;  %v633_v10 = vlaneseq (!%p2576_p7) }
 0x16a   : > { %616 = sbr.rel (%p2576_p7) target bundleno = 676 (0x2a4), region = 96  ;;  %v619_v2 = vsel (!%p2576_p7), %vm618_vm0, %v617_v1, 0.0 }
 0x16b   : > { %620 = vadd.xlane.f32.xlu0 (!%p2576_p7), %v619_v2  ;;  %v634_v12 = vshrl.u32 (!%p2576_p7), %v633_v10, 7 }
 0x16d   : > { %v635_v13 = vsub.s32 (!%p2576_p7), 0, %v634_v12  ;;  %v640_v14 = vsub.s32 (!%p2576_p7), 1, %v634_v12 }
 0x16f   : > { %v636_v15 = vrot.slane (!%p2576_p7), %v3974_v0, %v635_v13  ;;  %v641_v17 = vrot.slane (!%p2576_p7), %v3974_v0, %v640_v14 }
 0x1f8   : > { %v621_v3 = vpop.xlane.xlu0 %620 }
 0x1f9   : > { %v623_v4 = vmul.f32 0.03125, %v621_v3 }
 0x1fb   : > { %v624_v5 = vsub.f32 %v617_v1, %v623_v4 }
 0x1fd   : > { %v625_v6 = vmul.f32 %v624_v5, %v624_v5 }
 0x1ff   : > { %v626_v7 = vsel %vm618_vm0, %v625_v6, 0.0 }
 0x200   : > { %627 = vadd.xlane.f32.xlu0 %v626_v7 }
 0x28d   : > { %v628_v8 = vpop.xlane.xlu0 %627 }
 0x28e   : > { %v629_v9 = vmul.f32 0.03125, %v628_v8 }
 0x290   : > { %v630_v11 = vadd.f32 1e-12, %v629_v9 }
 0x292   : > { %2930 = vrsqrt.f32 %v630_v11 }
 0x29c   : > { %v2931_v16 = vpop.eup %2930 }
 0x29d   : > { %v632_v18 = vmul.f32 %v2931_v16, %v624_v5 }
 0x29f   : > { %v637_v19 = vmul.f32 %v636_v15, %v632_v18 }
 0x2a1   : > { %v642_v20 = vadd.f32 %v641_v17, %v637_v19 }
 0x2a3   : > { %643 = vst.msk [vmem:[#allocation2] sm:$0xff] %vm618_vm0, %v642_v20 }
 0x2a4 PF: > { %v2932_v21 = vld [vmem:[%s507_s27] sm:$0xff]   ;;  %v3395_v22 = vmov 0.0   ;;  %v2933_v23 = vld [vmem:[%s507_s27 + $0x8] sm:$0xff]   ;;  %vm3396_vm1 = vmmov 0   ;;  %vm670_vm2 = vcmask 261120   ;;  %v654_v26 = vlaneseq  ;;  %s3397_s20 = smov 104  }
 0x2a5   : > { %2660 = vmatprep.subr.bf16.mxu0 %v3395_v22  ;;  %2680 = vmatprep.subr.bf16.mxu1 %v3395_v22  ;;  %v4010_v29 = vld [vmem:[%s3964_s3] sm:$0xff]  ;;  %s3398_s21 = smov 120   ;;  %s3399_s14 = smov 96   ;;  %v3401_v39 = vmov 1983009808   ;;  %vm1174_vm3 = vcmask 64512  }
 0x2a6   : > { %2661 = vmatpush3.bf16.msra.mxu0 %v2932_v21  ;;  %2664 = vmatprep.mubr.msk.bf16.mxu0 %vm3396_vm1, %v3395_v22  ;;  %v4006_v27 = vshrl.u32 %v654_v26, 7  ;;  %s3400_s29 = smov 112   ;;  %v727_v40 = vunpack.c.l.s4 %v3401_v39  ;;  %v3402_v42 = vmov 1934713408   ;;  %s3404_s16 = smov 16   ;;  %vm1932_vm4 = vcmask 130048  }
 0x2a7   : > { %2662 = vmatprep.subr.bf16.mxu0 %v3395_v22  ;;  %2682 = vmatprep.mubr.msk.bf16.mxu1 %vm3396_vm1, %v3395_v22  ;;  %v759_v43 = vunpack.c.l.s4 %v3402_v42  ;;  %s3405_s2 = smov 8   ;;  %s3406_s11 = smov 24   ;;  %vm1934_vm5 = vcmask 195584  }
 0x2a8   : > { %v656_v28 = vsub.s32 0, %v4006_v27  ;;  %v728_v41 = vunpack.c.0.s8 %v727_v40  ;;  %s4411_s24 = sld [smem:[#allocation30_spill]] }
 0x2a9   : > { %v760_v49 = vunpack.c.0.s8 %v759_v43 }
 0x2aa   : > { %v3995_v24 = vld [vmem:[#allocation2] sm:$0xff]  ;;  %2663 = vmatpush3.bf16.msra.mxu0 %v2933_v23  ;;  %v657_v30 = vrot.slane %v4010_v29, %v656_v28  ;;  %v4035_v46 = vsub.s32 %v728_v41, %v4006_v27 }
 0x2ab   : > { %v649_v25 = vpack.c.bf16 %v3995_v24, %v3995_v24  ;;  %2668 = vmatprep.subr.bf16.mxu0 %v3395_v22  ;;  %v4046_v56 = vsub.s32 %v760_v49, %v4006_v27 }
 0x2ad   : > { %2665 = vmatmul.mubr.msk.bf16.vlgmr.msra.gmra.mrb[0].mxu0 %vm670_vm2, %v649_v25 }
 0x2ae   : > { %2670 = vmatprep.mubr.msk.bf16.mxu0 %vm3396_vm1, %v3395_v22  ;;  %p2611_p8 = scmp.ne.s32.totalorder %s4411_s24, 1 }
 0x2af   : > { %vm3408_vm6 = vmmov (!%p2611_p8), 0  }
 0x380   : > { %v708_v31 = vpop.f32.mrb[0].mxu0 }
 0x381   : > { %v4015_v32 = vadd.f32 %v708_v31, %v657_v30  ;;  %v2666_v33 = vpop.f32.mrb[1].mxu0 }
 0x382   : > { %v711_v34 = vpop.f32.mrb[2].mxu0 }
 0x383   : > { %721 = vrot.lane.b32.xlu1 %v4015_v32, %s3397_s20  ;;  %715 = vrot.lane.b32.xlu0 %v4015_v32, %s3398_s21  ;;  %v2667_v35 = vpop.f32.mrb[3].mxu0 }
 0x387   : > { %864 = vrot.lane.b32.xlu1 %v4015_v32, %s3399_s14  ;;  %718 = vrot.lane.b32.xlu0 %v4015_v32, %s3400_s29 }
 0x3f5   : > { %v4021_v36 = vpop.permute.xlu0 %715  ;;  %v4024_v37 = vpop.permute.xlu1 %721 }
 0x3f6   : > { %866 = vrot.lane.b32.xlu0 %v4021_v36, %s3399_s14  ;;  %v740_v47 = vcombine.low %v4021_v36, %v4024_v37  ;;  %v741_v48 = vcombine.high %v4021_v36, %v4024_v37 }
 0x3f8   : > { %v748_v52 = vrot.slane %v740_v47, %v4035_v46  ;;  %v755_v53 = vrot.slane %v741_v48, %v4035_v46 }
 0x3f9   : > { %v4026_v38 = vpop.permute.xlu0 %718  ;;  %v865_v54 = vpop.permute.xlu1 %864 }
 0x3fa   : > { %870 = vrot.lane.b32.xlu0 %v4024_v37, %s3399_s14  ;;  %868 = vrot.lane.b32.xlu1 %v4026_v38, %s3399_s14  ;;  %v724_v44 = vcombine.low %v4015_v32, %v4026_v38  ;;  %v725_v45 = vcombine.high %v4015_v32, %v4026_v38 }
 0x3fc   : > { %v732_v50 = vrot.slane %v724_v44, %v4035_v46  ;;  %v739_v51 = vrot.slane %v725_v45, %v4035_v46 }
 0x3fe   : > { %v756_v57 = vcombine.low %v732_v50, %v748_v52  ;;  %v757_v58 = vcombine.high %v732_v50, %v748_v52  ;;  %v772_v59 = vcombine.low %v739_v51, %v755_v53  ;;  %v773_v60 = vcombine.high %v739_v51, %v755_v53 }
 0x400   : > { %v764_v4 = vrot.slane %v756_v57, %v4046_v56  ;;  %v771_v5 = vrot.slane %v757_v58, %v4046_v56  ;;  %v780_v6 = vrot.slane %v772_v59, %v4046_v56  ;;  %v787_v7 = vrot.slane %v773_v60, %v4046_v56 }
 0x402   : > { %v792_v16 = vcombine.low %v764_v4, %v771_v5  ;;  %v2581_v17 = vcombine.high %v764_v4, %v771_v5  ;;  %v808_v18 = vcombine.low %v780_v6, %v787_v7  ;;  %v2582_v19 = vcombine.high %v780_v6, %v787_v7 }
 0x404   : > { %v799_v34 = vrot.slane %v792_v16, %v4035_v46  ;;  %v807_v35 = vrot.slane %v2581_v17, %v4035_v46  ;;  %v815_v39 = vrot.slane %v808_v18, %v4035_v46  ;;  %v823_v40 = vrot.slane %v2582_v19, %v4035_v46 }
 0x406   : > { %v824_v50 = vcombine.low %v799_v34, %v807_v35  ;;  %v840_v51 = vcombine.low %v815_v39, %v823_v40  ;;  %v825_v52 = vcombine.high %v799_v34, %v807_v35  ;;  %v841_v53 = vcombine.high %v815_v39, %v823_v40 }
 0x468   : > { %v867_v55 = vpop.permute.xlu0 %866 }
 0x46c   : > { %v869_v61 = vpop.permute.xlu1 %868  ;;  %v871_v62 = vpop.permute.xlu0 %870 }
 0x46d   : > { %v876_v63 = vcombine.low %v865_v54, %v869_v61  ;;  %v877_v1 = vcombine.high %v865_v54, %v869_v61  ;;  %v892_v2 = vcombine.low %v867_v55, %v871_v62  ;;  %v893_v3 = vcombine.high %v867_v55, %v871_v62 }
 0x46e   : > { %v832_v61 = vrot.slane %v824_v50, %v4046_v56  ;;  %v848_v62 = vrot.slane %v840_v51, %v4046_v56 }
 0x46f   : > { %v884_v8 = vrot.slane %v876_v63, %v4035_v46  ;;  %v891_v9 = vrot.slane %v877_v1, %v4035_v46  ;;  %v900_v10 = vrot.slane %v892_v2, %v4035_v46  ;;  %v907_v11 = vrot.slane %v893_v3, %v4035_v46 }
 0x470   : > { %v839_v2 = vrot.slane %v825_v52, %v4046_v56  ;;  %v855_v3 = vrot.slane %v841_v53, %v4046_v56  ;;  %v856_v7 = vcombine.low %v832_v61, %v848_v62 }
 0x471   : > { %v908_v12 = vcombine.low %v884_v8, %v900_v10  ;;  %v909_v13 = vcombine.high %v884_v8, %v900_v10  ;;  %v924_v14 = vcombine.low %v891_v9, %v907_v11  ;;  %v925_v15 = vcombine.high %v891_v9, %v907_v11 }
 0x472   : > { %v858_v8 = vcombine.low %v839_v2, %v855_v3  ;;  %v860_v10 = vpack.c.bf16 %v856_v7, %v856_v7  ;;  %v859_v18 = vcombine.high %v839_v2, %v855_v3 }
 0x473   : > { %v916_v20 = vrot.slane %v908_v12, %v4046_v56  ;;  %v923_v21 = vrot.slane %v909_v13, %v4046_v56  ;;  %v932_v23 = vrot.slane %v924_v14, %v4046_v56  ;;  %v939_v25 = vrot.slane %v925_v15, %v4046_v56 }
 0x474   : > { %v862_v11 = vpack.c.bf16 %v858_v8, %v858_v8  ;;  %v857_v14 = vcombine.high %v832_v61, %v848_v62  ;;  %v863_v19 = vpack.c.bf16 %v859_v18, %v859_v18 }
 0x475   : > { %v944_v26 = vcombine.low %v916_v20, %v923_v21  ;;  %v2583_v30 = vcombine.high %v916_v20, %v923_v21  ;;  %v960_v31 = vcombine.low %v932_v23, %v939_v25  ;;  %v2584_v33 = vcombine.high %v932_v23, %v939_v25  ;;  %v646_v20 = vld [vmem:[%s494_s10] sm:$0x1]  ;;  %s3403_s10 = smov 64  }
 0x476   : > { %v861_v16 = vpack.c.bf16 %v857_v14, %v857_v14  ;;  %v2577_v21 = vadd.f32 -1.0, %v646_v20 }
 0x477   : > { %v951_v41 = vrot.slane %v944_v26, %v4035_v46  ;;  %v959_v42 = vrot.slane %v2583_v30, %v4035_v46  ;;  %v967_v43 = vrot.slane %v960_v31, %v4035_v46  ;;  %v975_v44 = vrot.slane %v2584_v33, %v4035_v46 }
 0x478   : > { %v648_v23 = vmul.f32 1e+09, %v2577_v21 }
 0x479   : > { %v976_v45 = vcombine.low %v951_v41, %v959_v42  ;;  %v992_v47 = vcombine.low %v967_v43, %v975_v44  ;;  %v977_v48 = vcombine.high %v951_v41, %v959_v42  ;;  %v993_v49 = vcombine.high %v967_v43, %v975_v44 }
 0x47a   : > { %v1172_v25 = vrot.slane %v648_v23, %v656_v28 }
 0x47b   : > { %v984_v54 = vrot.slane %v976_v45, %v4046_v56  ;;  %v1000_v55 = vrot.slane %v992_v47, %v4046_v56  ;;  %v991_v57 = vrot.slane %v977_v48, %v4046_v56  ;;  %v1007_v58 = vrot.slane %v993_v49, %v4046_v56 }
 0x47d   : > { %v1008_v59 = vcombine.low %v984_v54, %v1000_v55  ;;  %v1010_v60 = vcombine.low %v991_v57, %v1007_v58  ;;  %v1009_v6 = vcombine.high %v984_v54, %v1000_v55  ;;  %v1011_v13 = vcombine.high %v991_v57, %v1007_v58 }
 0x47f   : > { %v1012_v63 = vpack.c.bf16 %v1008_v59, %v1008_v59  ;;  %v1014_v1 = vpack.c.bf16 %v1010_v60, %v1010_v60  ;;  %v1013_v9 = vpack.c.bf16 %v1009_v6, %v1009_v6  ;;  %v1015_v15 = vpack.c.bf16 %v1011_v13, %v1011_v13 }
 0x481   : > { %v1179_v4 = vsel %vm1174_vm3, %v1012_v63, 0  ;;  %v1271_v5 = vsel %vm1174_vm3, %v1014_v1, 0  ;;  %v1225_v12 = vsel %vm1174_vm3, %v1013_v9, 0  ;;  %v1317_v17 = vsel %vm1174_vm3, %v1015_v15, 0 }
 0x482   : > { %2669 = vmatpush3.bf16.xpose.msra.mxu0 %v1179_v4  ;;  %2681 = vmatpush3.bf16.xpose.msra.mxu1 %v1271_v5 }
 0x483   : > { %2674 = vmatprep.subr.bf16.mxu0 %v3395_v22  ;;  %2692 = vmatprep.subr.bf16.mxu1 %v3395_v22 }
 0x489   : > { %2671 = vmatmul.mubr.msk.bf16.vlgmr.msra.gmra.mrb[4].mxu0 %vm1174_vm3, %v860_v10  ;;  %2683 = vmatmul.mubr.msk.bf16.vlgmr.msra.gmra.mrb[0].mxu1 %vm1174_vm3, %v862_v11 }
 0x48a   : > { %2675 = vmatpush3.bf16.xpose.msra.mxu0 %v1225_v12  ;;  %2676 = vmatprep.mubr.msk.bf16.mxu0 %vm3396_vm1, %v3395_v22 }
 0x48b   : > { %2686 = vmatprep.subr.bf16.mxu0 %v3395_v22  ;;  %2694 = vmatprep.mubr.msk.bf16.mxu1 %vm3396_vm1, %v3395_v22 }
 0x491   : > { %2677 = vmatmul.mubr.msk.bf16.vlgmr.msra.gmra.mrb[8].mxu0 %vm1174_vm3, %v861_v16 }
 0x492   : > { %2687 = vmatpush3.bf16.xpose.msra.mxu0 %v1317_v17  ;;  %2688 = vmatprep.mubr.msk.bf16.mxu0 %vm3396_vm1, %v3395_v22 }
 0x493   : > { %2698 = vmatprep.subr.bf16.mxu0 %v3395_v22 }
 0x499   : > { %2689 = vmatmul.mubr.msk.bf16.vlgmr.msra.gmra.mrb[12].mxu0 %vm1174_vm3, %v863_v19 }
 0x49a   : > { %2700 = vmatprep.mubr.msk.bf16.mxu0 %vm3396_vm1, %v3395_v22 }
 0x55c   : > { %v1215_v26 = vpop.f32.mrb[4].mxu0  ;;  %v1307_v30 = vpop.f32.mrb[0].mxu1 }
 0x55d   : > { %v1216_v31 = vadd.f32 %v1215_v26, %v1172_v25  ;;  %v2672_v33 = vpop.f32.mrb[5].mxu0  ;;  %v2684_v34 = vpop.f32.mrb[1].mxu1  ;;  %v1308_v48 = vadd.f32 %v1307_v30, %v1172_v25 }
 0x55e   : > { %v1218_v35 = vpop.f32.mrb[6].mxu0  ;;  %v1310_v39 = vpop.f32.mrb[2].mxu1 }
 0x55f   : > { %v2673_v40 = vpop.f32.mrb[7].mxu0  ;;  %v2685_v41 = vpop.f32.mrb[3].mxu1  ;;  %v1359_v42 = vsel %vm1174_vm3, %v1216_v31, -inf  ;;  %v1365_v50 = vsel %vm1174_vm3, %v1308_v48, -inf }
 0x560   : > { %1360 = vmax.xlane.f32.xlu1 %v1359_v42 }
 0x564   : > { %v1261_v43 = vpop.f32.mrb[8].mxu0 }
 0x565   : > { %v1262_v44 = vadd.f32 %v1261_v43, %v1172_v25  ;;  %v2678_v45 = vpop.f32.mrb[9].mxu0 }
 0x566   : > { %v1264_v47 = vpop.f32.mrb[10].mxu0 }
 0x567   : > { %v2679_v49 = vpop.f32.mrb[11].mxu0  ;;  %v1362_v28 = vsel %vm1174_vm3, %v1262_v44, -inf }
 0x568   : > { %1363 = vmax.xlane.f32.xlu0 %v1362_v28 }
 0x56c   : > { %1366 = vmax.xlane.f32.xlu0 %v1365_v50  ;;  %v1353_v51 = vpop.f32.mrb[12].mxu0 }
 0x56d   : > { %v1354_v52 = vadd.f32 %v1353_v51, %v1172_v25  ;;  %v2690_v53 = vpop.f32.mrb[13].mxu0 }
 0x56e   : > { %v1356_v54 = vpop.f32.mrb[14].mxu0 }
 0x56f   : > { %v2691_v55 = vpop.f32.mrb[15].mxu0  ;;  %v1368_v57 = vsel %vm1174_vm3, %v1354_v52, -inf }
 0x570   : > { %1369 = vmax.xlane.f32.xlu1 %v1368_v57 }
 0x581   : > { %1018 = vrot.lane.b32.xlu1 %v4021_v36, %s3403_s10 }
 0x582   : > { %1016 = vrot.lane.b32.xlu0 %v4015_v32, %s3403_s10 }
 0x585   : > { %1020 = vrot.lane.b32.xlu1 %v4026_v38, %s3403_s10 }
 0x586   : > { %1022 = vrot.lane.b32.xlu0 %v4024_v37, %s3403_s10 }
 0x5ed   : > { %v1361_v58 = vpop.xlane.xlu1 %1360 }
 0x5ee   : > { %v1371_v59 = vsub.f32 %v1216_v31, %v1361_v58 }
 0x5f0   : > { %v1375_v60 = vmul.f32 1.442695, %v1371_v59 }
 0x5f2   : > { %2946 = vpow2.f32 %v1375_v60 }
 0x5f5   : > { %v1364_v61 = vpop.xlane.xlu0 %1363 }
 0x5f6   : > { %v1372_v62 = vsub.f32 %v1262_v44, %v1364_v61 }
 0x5f8   : > { %v1377_v63 = vmul.f32 1.442695, %v1372_v62 }
 0x5f9   : > { %v1367_v1 = vpop.xlane.xlu0 %1366 }
 0x5fa   : > { %2948 = vpow2.f32 %v1377_v63  ;;  %v1373_v2 = vsub.f32 %v1308_v48, %v1367_v1 }
 0x5fc   : > { %v4108_v3 = vpop.eup %2946  ;;  %v1379_v4 = vmul.f32 1.442695, %v1373_v2 }
 0x5fd   : > { %v1370_v36 = vpop.xlane.xlu1 %1369  ;;  %v1383_v32 = vsel %vm1174_vm3, %v4108_v3, 0.0  ;;  %v1017_v10 = vpop.permute.xlu0 %1016 }
 0x5fe   : > { %2950 = vpow2.f32 %v1379_v4  ;;  %v1374_v38 = vsub.f32 %v1354_v52, %v1370_v36  ;;  %1384 = vadd.xlane.f32.xlu1 %v1383_v32 }
 0x600   : > { %v1381_v37 = vmul.f32 1.442695, %v1374_v38 }
 0x601   : > { %v1019_v8 = vpop.permute.xlu1 %1018  ;;  %v1023_v14 = vpop.permute.xlu0 %1022 }
 0x602   : > { %2952 = vpow2.f32 %v1381_v37  ;;  %v1044_v17 = vcombine.low %v1019_v8, %v1023_v14  ;;  %v1045_v18 = vcombine.high %v1019_v8, %v1023_v14 }
 0x604   : > { %v4112_v5 = vpop.eup %2948  ;;  %v1052_v21 = vrot.slane %v1044_v17, %v4035_v46  ;;  %v1059_v23 = vrot.slane %v1045_v18, %v4035_v46 }
 0x605   : > { %v1386_v6 = vsel %vm1174_vm3, %v4112_v5, 0.0  ;;  %v1021_v13 = vpop.permute.xlu1 %1020 }
 0x606   : > { %1387 = vadd.xlane.f32.xlu0 %v1386_v6  ;;  %v1028_v15 = vcombine.low %v1017_v10, %v1021_v13  ;;  %v1029_v16 = vcombine.high %v1017_v10, %v1021_v13 }
 0x608   : > { %v4116_v7 = vpop.eup %2950  ;;  %v1036_v19 = vrot.slane %v1028_v15, %v4035_v46  ;;  %v1043_v20 = vrot.slane %v1029_v16, %v4035_v46 }
 0x609   : > { %v1389_v9 = vsel %vm1174_vm3, %v4116_v7, 0.0 }
 0x60a   : > { %1390 = vadd.xlane.f32.xlu0 %v1389_v9  ;;  %v1060_v25 = vcombine.low %v1036_v19, %v1052_v21  ;;  %v1061_v26 = vcombine.high %v1036_v19, %v1052_v21  ;;  %v1076_v30 = vcombine.low %v1043_v20, %v1059_v23  ;;  %v1077_v31 = vcombine.high %v1043_v20, %v1059_v23 }
 0x60c   : > { %v4120_v11 = vpop.eup %2952  ;;  %v1068_v33 = vrot.slane %v1060_v25, %v4046_v56  ;;  %v1075_v34 = vrot.slane %v1061_v26, %v4046_v56  ;;  %v1084_v35 = vrot.slane %v1076_v30, %v4046_v56  ;;  %v1091_v39 = vrot.slane %v1077_v31, %v4046_v56 }
 0x60d   : > { %v1392_v12 = vsel %vm1174_vm3, %v4120_v11, 0.0 }
 0x60e   : > { %1393 = vadd.xlane.f32.xlu1 %v1392_v12  ;;  %v1096_v40 = vcombine.low %v1068_v33, %v1075_v34  ;;  %v2585_v41 = vcombine.high %v1068_v33, %v1075_v34  ;;  %v1112_v42 = vcombine.low %v1084_v35, %v1091_v39  ;;  %v2586_v43 = vcombine.high %v1084_v35, %v1091_v39 }
 0x610   : > { %v1103_v44 = vrot.slane %v1096_v40, %v4035_v46  ;;  %v1111_v45 = vrot.slane %v2585_v41, %v4035_v46  ;;  %v1119_v47 = vrot.slane %v1112_v42, %v4035_v46  ;;  %v1127_v48 = vrot.slane %v2586_v43, %v4035_v46 }
 0x612   : > { %v1128_v49 = vcombine.low %v1103_v44, %v1111_v45  ;;  %v1144_v28 = vcombine.low %v1119_v47, %v1127_v48  ;;  %v1129_v52 = vcombine.high %v1103_v44, %v1111_v45  ;;  %v1145_v53 = vcombine.high %v1119_v47, %v1127_v48 }
 0x614   : > { %v1136_v50 = vrot.slane %v1128_v49, %v4046_v56  ;;  %v1152_v51 = vrot.slane %v1144_v28, %v4046_v56  ;;  %v1143_v55 = vrot.slane %v1129_v52, %v4046_v56  ;;  %v1159_v57 = vrot.slane %v1145_v53, %v4046_v56 }
 0x616   : > { %v1160_v54 = vcombine.low %v1136_v50, %v1152_v51  ;;  %v1161_v59 = vcombine.high %v1136_v50, %v1152_v51  ;;  %v1162_v60 = vcombine.low %v1143_v55, %v1159_v57  ;;  %v1163_v63 = vcombine.high %v1143_v55, %v1159_v57 }
 0x618   : > { %v1164_v58 = vpack.c.bf16 %v1160_v54, %v1160_v54  ;;  %v1165_v61 = vpack.c.bf16 %v1161_v59, %v1161_v59  ;;  %v1166_v62 = vpack.c.bf16 %v1162_v60, %v1162_v60  ;;  %v1167_v1 = vpack.c.bf16 %v1163_v63, %v1163_v63  ;;  %v2934_v60 = vld [vmem:[%s516_s8] sm:$0xff]  }
 0x637   : > { %1407 = vxpose.xlu0.c.b16.start.end [1/1] (short) (narrow) %v1164_v58, 16 }
 0x63b   : > { %1469 = vxpose.xlu1.c.b16.start.end [1/1] (short) (narrow) %v1165_v61, 16  ;;  %1531 = vxpose.xlu0.c.b16.start.end [1/1] (short) (narrow) %v1166_v62, 16 }
 0x63f   : > { %1593 = vxpose.xlu1.c.b16.start.end [1/1] (short) (narrow) %v1167_v1, 16 }
 0x68b   : > { %v1385_v2 = vpop.xlane.xlu1 %1384 }
 0x68c   : > { %2954 = vrcp.f32 %v1385_v2 }
 0x693   : > { %v1388_v4 = vpop.xlane.xlu0 %1387 }
 0x694   : > { %2956 = vrcp.f32 %v1388_v4 }
 0x696   : > { %v2955_v36 = vpop.eup %2954 }
 0x697   : > { %v1391_v32 = vpop.xlane.xlu0 %1390  ;;  %v1399_v38 = vmul.f32 %v2955_v36, %v4108_v3 }
 0x698   : > { %2958 = vrcp.f32 %v1391_v32 }
 0x699   : > { %v1403_v37 = vpack.c.bf16 %v1399_v38, %v1399_v38  ;;  %v2935_v38 = vld [vmem:[%s516_s8 + $0x8] sm:$0xff]  }
 0x69b   : > { %v1394_v6 = vpop.xlane.xlu1 %1393  ;;  %v1427_v8 = vsel %vm1174_vm3, %v1403_v37, 0 }
 0x69c   : > { %2960 = vrcp.f32 %v1394_v6  ;;  %2693 = vmatpush3.bf16.xpose.msra.mxu1 %v1427_v8 }
 0x69d   : > { %2704 = vmatprep.subr.bf16.mxu1 %v3395_v22  ;;  %v1415_v12 = vpop.trf.xlu0 }
 0x69e   : > { %v2957_v9 = vpop.eup %2956 }
 0x69f   : > { %v1400_v10 = vmul.f32 %v2957_v9, %v4112_v5 }
 0x6a1   : > { %v1404_v13 = vpack.c.bf16 %v1400_v10, %v1400_v10  ;;  %v1477_v19 = vpop.trf.xlu1  ;;  %v1539_v21 = vpop.trf.xlu0 }
 0x6a2   : > { %v2959_v14 = vpop.eup %2958 }
 0x6a3   : > { %v1489_v15 = vsel %vm1174_vm3, %v1404_v13, 0  ;;  %2695 = vmatmul.mubr.msk.bf16.vlgmr.msra.gmra.mrb[4].mxu1 %vm1174_vm3, %v1415_v12  ;;  %v1401_v3 = vmul.f32 %v2959_v14, %v4116_v7 }
 0x6a4   : > { %2699 = vmatpush3.bf16.xpose.msra.mxu0 %v1489_v15  ;;  %2706 = vmatprep.mubr.msk.bf16.mxu1 %vm3396_vm1, %v3395_v22 }
 0x6a5   : > { %v1405_v16 = vpack.c.bf16 %v1401_v3, %v1401_v3  ;;  %2710 = vmatprep.subr.bf16.mxu0 %v3395_v22  ;;  %v1601_v23 = vpop.trf.xlu1 }
 0x6a6   : > { %v2961_v17 = vpop.eup %2960 }
 0x6a7   : > { %v1551_v18 = vsel %vm1174_vm3, %v1405_v16, 0  ;;  %v1402_v5 = vmul.f32 %v2961_v17, %v4120_v11 }
 0x6a8   : > { %2705 = vmatpush3.bf16.xpose.msra.mxu1 %v1551_v18 }
 0x6a9   : > { %v1406_v20 = vpack.c.bf16 %v1402_v5, %v1402_v5  ;;  %2716 = vmatprep.subr.bf16.mxu1 %v3395_v22 }
 0x6ab   : > { %2701 = vmatmul.mubr.msk.bf16.vlgmr.msra.gmra.mrb[16].mxu0 %vm1174_vm3, %v1477_v19  ;;  %v1613_v7 = vsel %vm1174_vm3, %v1406_v20, 0 }
 0x6ac   : > { %2711 = vmatpush3.bf16.xpose.msra.mxu0 %v1613_v7  ;;  %2712 = vmatprep.mubr.msk.bf16.mxu0 %vm3396_vm1, %v3395_v22 }
 0x6ad   : > { %2724 = vmatprep.subr.bf16.mxu0 %v3395_v22 }
 0x6af   : > { %2707 = vmatmul.mubr.msk.bf16.vlgmr.msra.gmra.mrb[8].mxu1 %vm1174_vm3, %v1539_v21 }
 0x6b0   : > { %2720 = vmatprep.mubr.msk.bf16.mxu1 %vm3396_vm1, %v3395_v22  ;;  %2717 = vmatpush3.bf16.msra.mxu1 %v2934_v60 }
 0x6b1   : > { %2718 = vmatprep.subr.bf16.mxu1 %v3395_v22 }
 0x6b3   : > { %2713 = vmatmul.mubr.msk.bf16.vlgmr.msra.gmra.mrb[20].mxu0 %vm1174_vm3, %v1601_v23 }
 0x6b4   : > { %2728 = vmatprep.mubr.msk.bf16.mxu0 %vm3396_vm1, %v3395_v22  ;;  %2719 = vmatpush3.bf16.msra.mxu1 %v2935_v38  ;;  %v2942_v38 = vld [vmem:[%s3962_s30 + $0x20] sm:$0xff]  }
 0x6b5   : > { %2732 = vmatprep.subr.bf16.mxu1 %v3395_v22 }
 0x776   : > { %v1463_v11 = vpop.f32.mrb[4].mxu1 }
 0x777   : > { %v2696_v25 = vpop.f32.mrb[5].mxu1  ;;  %1655 = vxpose.xlu0.b32.start.end [1/1] (short) (narrow) %v1463_v11, 8 }
 0x778   : > { %v1466_v26 = vpop.f32.mrb[6].mxu1 }
 0x779   : > { %v2697_v30 = vpop.f32.mrb[7].mxu1 }
 0x77e   : > { %v1525_v31 = vpop.f32.mrb[16].mxu0 }
 0x77f   : > { %v2702_v33 = vpop.f32.mrb[17].mxu0  ;;  %1687 = vxpose.xlu1.b32.start.end [1/1] (short) (narrow) %v1525_v31, 8 }
 0x780   : > { %v1528_v34 = vpop.f32.mrb[18].mxu0 }
 0x781   : > { %v2703_v35 = vpop.f32.mrb[19].mxu0  ;;  %v1943_v34 = vsub.s32 1, %v4006_v27 }
 0x782   : > { %v1587_v39 = vpop.f32.mrb[8].mxu1 }
 0x783   : > { %1719 = vxpose.xlu0.b32.start.end [1/1] (short) (narrow) %v1587_v39, 8  ;;  %v2708_v40 = vpop.f32.mrb[9].mxu1  ;;  %v1944_v35 = vrot.slane %v4010_v29, %v1943_v34 }
 0x784   : > { %v1590_v41 = vpop.f32.mrb[10].mxu1 }
 0x785   : > { %v2709_v42 = vpop.f32.mrb[11].mxu1 }
 0x786   : > { %v1649_v43 = vpop.f32.mrb[20].mxu0 }
 0x787   : > { %1751 = vxpose.xlu0.b32.start.end [1/1] (short) (narrow) %v1649_v43, 8  ;;  %v2714_v44 = vpop.f32.mrb[21].mxu0 }
 0x788   : > { %v1652_v45 = vpop.f32.mrb[22].mxu0 }
 0x789   : > { %v2715_v47 = vpop.f32.mrb[23].mxu0 }
 0x7f7   : > { %v1671_v48 = vpop.trf.xlu0 }
 0x7ff   : > { %v1703_v28 = vpop.trf.xlu1 }
 0x803   : > { %v1735_v49 = vpop.trf.xlu0 }
 0x804   : > { %v1783_v50 = vcombine.low %v1671_v48, %v1735_v49  ;;  %v1784_v51 = vcombine.high %v1671_v48, %v1735_v49 }
 0x806   : > { %v1791_v55 = vrot.slane %v1783_v50, %v4035_v46  ;;  %v1798_v57 = vrot.slane %v1784_v51, %v4035_v46  ;;  %v2936_v51 = vld [vmem:[%s525_s15] sm:$0xff]  }
 0x807   : > { %v1767_v52 = vpop.trf.xlu0  ;;  %2725 = vmatpush3.bf16.msra.mxu0 %v2936_v51 }
 0x808   : > { %v1799_v53 = vcombine.low %v1703_v28, %v1767_v52  ;;  %v1800_v54 = vcombine.high %v1703_v28, %v1767_v52  ;;  %2726 = vmatprep.subr.bf16.mxu0 %v3395_v22  ;;  %v2937_v52 = vld [vmem:[%s525_s15 + $0x8] sm:$0xff]  }
 0x80a   : > { %v1807_v58 = vrot.slane %v1799_v53, %v4035_v46  ;;  %v1814_v59 = vrot.slane %v1800_v54, %v4035_v46 }
 0x80b   : > { %2727 = vmatpush3.bf16.msra.mxu0 %v2937_v52 }
 0x80c   : > { %v1815_v61 = vcombine.low %v1791_v55, %v1807_v58  ;;  %v1816_v62 = vcombine.high %v1791_v55, %v1807_v58  ;;  %v1831_v63 = vcombine.low %v1798_v57, %v1814_v59  ;;  %v1832_v1 = vcombine.high %v1798_v57, %v1814_v59 }
 0x80d   : > { %v2017_v55 = vsub.s32 2, %v4006_v27  ;;  %v2022_v57 = vsub.s32 3, %v4006_v27 }
 0x80e   : > { %v1823_v2 = vrot.slane %v1815_v61, %v4046_v56  ;;  %v1830_v4 = vrot.slane %v1816_v62, %v4046_v56  ;;  %v1839_v36 = vrot.slane %v1831_v63, %v4046_v56  ;;  %v1846_v32 = vrot.slane %v1832_v1, %v4046_v56 }
 0x80f   : > { %v2018_v58 = vrot.slane %v4010_v29, %v2017_v55  ;;  %v2023_v61 = vrot.slane %v4010_v29, %v2022_v57  ;;  %v2969_v57 = vld [vmem:[#allocation17 + $0x8] sm:$0xff] (!%p2611_p8)  }
 0x810   : > { %v1851_v37 = vcombine.low %v1823_v2, %v1830_v4  ;;  %v2595_v6 = vcombine.high %v1823_v2, %v1830_v4  ;;  %v1867_v8 = vcombine.low %v1839_v36, %v1846_v32  ;;  %v2596_v9 = vcombine.high %v1839_v36, %v1846_v32  ;;  %v2938_v2 = vld [vmem:[%s3962_s30] sm:$0xff]   ;;  %v2939_v4 = vld [vmem:[%s3962_s30 + $0x8] sm:$0xff]   ;;  %v2940_v36 = vld [vmem:[%s3962_s30 + $0x10] sm:$0xff]  }
 0x811   : > { %v2941_v32 = vld [vmem:[%s3962_s30 + $0x18] sm:$0xff]  }
 0x812   : > { %v1858_v10 = vrot.slane %v1851_v37, %v4035_v46  ;;  %v1866_v12 = vrot.slane %v2595_v6, %v4035_v46  ;;  %v1874_v13 = vrot.slane %v1867_v8, %v4035_v46  ;;  %v1882_v14 = vrot.slane %v2596_v9, %v4035_v46  ;;  %v2943_v37 = vld [vmem:[%s3962_s30 + $0x28] sm:$0xff]   ;;  %v2944_v6 = vld [vmem:[%s3962_s30 + $0x30] sm:$0xff]   ;;  %v2945_v8 = vld [vmem:[%s3962_s30 + $0x38] sm:$0xff]  }
 0x813   : > { %v2032_v9 = vsub.s32 4, %v4006_v27 }
 0x814   : > { %v1884_v15 = vcombine.high %v1858_v10, %v1866_v12  ;;  %v1900_v3 = vcombine.high %v1874_v13, %v1882_v14  ;;  %v1883_v16 = vcombine.low %v1858_v10, %v1866_v12  ;;  %v1899_v17 = vcombine.low %v1874_v13, %v1882_v14 }
 0x815   : > { %v2033_v10 = vrot.slane %v4010_v29, %v2032_v9 }
 0x816   : > { %v1898_v18 = vrot.slane %v1884_v15, %v4046_v56  ;;  %v1914_v5 = vrot.slane %v1900_v3, %v4046_v56  ;;  %v1891_v19 = vrot.slane %v1883_v16, %v4046_v56  ;;  %v1907_v20 = vrot.slane %v1899_v17, %v4046_v56 }
 0x818   : > { %v1917_v7 = vcombine.low %v1898_v18, %v1914_v5  ;;  %v1916_v21 = vcombine.high %v1891_v19, %v1907_v20  ;;  %v1915_v23 = vcombine.low %v1891_v19, %v1907_v20  ;;  %v1918_v46 = vcombine.high %v1898_v18, %v1914_v5 }
 0x81a   : > { %1924 = vrot.lane.b32.xlu0 %v1917_v7, %s3404_s16  ;;  %1920 = vrot.lane.b32.xlu1 %v1916_v21, %s3405_s2 }
 0x81e   : > { %1928 = vrot.lane.b32.xlu1 %v1918_v46, %s3406_s11  ;;  %v2117_v46 = vsub.s32 5, %v4006_v27 }
 0x88c   : > { %v1921_v11 = vpop.permute.xlu1 %1920  ;;  %v1925_v25 = vpop.permute.xlu0 %1924 }
 0x88d   : > { %v1931_v26 = vsel %vm1174_vm3, %v1915_v23, %v1921_v11  ;;  %v2118_v11 = vrot.slane %v4010_v29, %v2117_v46 }
 0x88e   : > { %v1933_v31 = vsel %vm1932_vm4, %v1931_v26, %v1925_v25 }
 0x890   : > { %v1929_v30 = vpop.permute.xlu1 %1928 }
 0x891   : > { %v1935_v33 = vsel %vm1934_vm5, %v1933_v31, %v1929_v30 }
 0x892   : > { %v1936_v56 = vpack.c.bf16 %v1935_v33, %v1935_v33 }
 0x894   : > { %2721 = vmatmul.mubr.msk.bf16.vlgmr.msra.gmra.mrb[12].mxu1 %vm670_vm2, %v1936_v56 }
 0x895   : > { %2748 = vmatprep.mubr.msk.bf16.mxu1 %vm3396_vm1, %v3395_v22  ;;  %2733 = vmatpush3.bf16.msra.mxu1 %v2938_v2 }
 0x896   : > { %2734 = vmatprep.subr.bf16.mxu1 %v3395_v22 }
 0x899   : > { %2735 = vmatpush3.bf16.msra.mxu1 %v2939_v4 }
 0x89a   : > { %2736 = vmatprep.subr.bf16.mxu1 %v3395_v22 }
 0x89d   : > { %2737 = vmatpush3.bf16.msra.mxu1 %v2940_v36 }
 0x89e   : > { %2738 = vmatprep.subr.bf16.mxu1 %v3395_v22 }
 0x8a1   : > { %2739 = vmatpush3.bf16.msra.mxu1 %v2941_v32 }
 0x8a2   : > { %2740 = vmatprep.subr.bf16.mxu1 %v3395_v22 }
 0x8a5   : > { %2741 = vmatpush3.bf16.msra.mxu1 %v2942_v38 }
 0x8a6   : > { %2742 = vmatprep.subr.bf16.mxu1 %v3395_v22 }
 0x8a9   : > { %2743 = vmatpush3.bf16.msra.mxu1 %v2943_v37 }
 0x8aa   : > { %2744 = vmatprep.subr.bf16.mxu1 %v3395_v22 }
 0x8ad   : > { %2745 = vmatpush3.bf16.msra.mxu1 %v2944_v6 }
 0x8ae   : > { %2746 = vmatprep.subr.bf16.mxu1 %v3395_v22 }
 0x8b1   : > { %2747 = vmatpush3.bf16.msra.mxu1 %v2945_v8 }
 0x967   : > { %v1994_v39 = vpop.f32.mrb[12].mxu1 }
 0x968   : > { %v1995_v40 = vadd.f32 %v1994_v39, %v1944_v35  ;;  %v2722_v41 = vpop.f32.mrb[13].mxu1 }
 0x969   : > { %v1997_v42 = vpop.f32.mrb[14].mxu1 }
 0x96a   : > { %v2723_v43 = vpop.f32.mrb[15].mxu1  ;;  %v2000_v44 = vadd.f32 %v1995_v40, %v3995_v24 }
 0x96c   : > { %v2001_v45 = vsel %vm670_vm2, %v2000_v44, 0.0 }
 0x96d   : > { %2002 = vadd.xlane.f32.xlu1 %v2001_v45 }
 0x9fa   : > { %v2003_v47 = vpop.xlane.xlu1 %2002 }
 0x9fb   : > { %v2005_v48 = vmul.f32 0.03125, %v2003_v47  ;;  %v2223_v47 = vsub.s32 6, %v4006_v27 }
 0x9fd   : > { %v2006_v49 = vsub.f32 %v2000_v44, %v2005_v48  ;;  %v2228_v48 = vsub.s32 7, %v4006_v27 }
 0x9ff   : > { %v2007_v28 = vmul.f32 %v2006_v49, %v2006_v49 }
 0xa01   : > { %v2008_v50 = vsel %vm670_vm2, %v2007_v28, 0.0 }
 0xa02   : > { %2009 = vadd.xlane.f32.xlu0 %v2008_v50  ;;  %v2229_v50 = vrot.slane %v4010_v29, %v2228_v48 }
 0xa8f   : > { %v2010_v24 = vpop.xlane.xlu0 %2009 }
 0xa90   : > { %v2011_v53 = vmul.f32 0.03125, %v2010_v24 }
 0xa92   : > { %v2012_v54 = vadd.f32 1e-12, %v2011_v53  ;;  %v2968_v53 = vld [vmem:[#allocation17] sm:$0xff] (!%p2611_p8)  }
 0xa94   : > { %2962 = vrsqrt.f32 %v2012_v54  ;;  %v3407_v54 = vmov (!%p2611_p8), 0.0  }
 0xa95   : > { %2752 = vmatprep.subr.bf16.mxu0 (!%p2611_p8), %v3407_v54 }
 0xa9e   : > { %v2963_v59 = vpop.eup %2962 }
 0xa9f   : > { %v2014_v60 = vmul.f32 %v2963_v59, %v2006_v49  ;;  %v2224_v49 = vrot.slane %v4010_v29, %v2223_v47  ;;  %v2244_v29 = vrot.slane (!%p2611_p8), %v3974_v0, %v2017_v55 }
 0xaa1   : > { %v2019_v62 = vmul.f32 %v2018_v58, %v2014_v60 }
 0xaa3   : > { %v2024_v63 = vadd.f32 %v2023_v61, %v2019_v62 }
 0xaa5   : > { %v2025_v1 = vpack.c.bf16 %v2024_v63, %v2024_v63 }
 0xaa7   : > { %2729 = vmatmul.mubr.msk.bf16.vlgmr.msra.gmra.mrb[24].mxu0 %vm670_vm2, %v2025_v1 }
 0xaa8   : > { %2753 = vmatpush3.bf16.msra.mxu0 (!%p2611_p8), %v2968_v53  ;;  %2756 = vmatprep.mubr.msk.bf16.mxu0 (!%p2611_p8), %vm3408_vm6, %v3407_v54 }
 0xaa9   : > { %2754 = vmatprep.subr.bf16.mxu0 (!%p2611_p8), %v3407_v54 }
 0xaac   : > { %2755 = vmatpush3.bf16.msra.mxu0 (!%p2611_p8), %v2969_v57 }
 0xb7a   : > { %v2083_v12 = vpop.f32.mrb[24].mxu0 }
 0xb7b   : > { %v2084_v13 = vadd.f32 %v2083_v12, %v2033_v10  ;;  %v2730_v14 = vpop.f32.mrb[25].mxu0 }
 0xb7c   : > { %v2086_v15 = vpop.f32.mrb[26].mxu0 }
 0xb7d   : > { %v2089_v3 = vmul.f32 %v2084_v13, %v2084_v13  ;;  %v2731_v16 = vpop.f32.mrb[27].mxu0 }
 0xb7f   : > { %v2090_v17 = vmul.f32 %v2089_v3, %v2084_v13 }
 0xb81   : > { %v2091_v18 = vmul.f32 0.044715, %v2090_v17 }
 0xb83   : > { %v2092_v5 = vadd.f32 %v2091_v18, %v2084_v13 }
 0xb85   : > { %v2093_v19 = vmul.f32 0.7978846, %v2092_v5 }
 0xb87   : > { %2964 = vtanh.f32 %v2093_v19 }
 0xb91   : > { %v2965_v20 = vpop.eup %2964 }
 0xb92   : > { %v2095_v7 = vadd.f32 1.0, %v2965_v20 }
 0xb94   : > { %v2096_v21 = vmul.f32 0.5, %v2095_v7 }
 0xb96   : > { %v2097_v22 = vmul.f32 %v2096_v21, %v2084_v13 }
 0xb98   : > { %v2098_v23 = vpack.c.bf16 %v2097_v22, %v2097_v22 }
 0xb9a   : > { %2749 = vmatmul.mubr.bf16.vlgmr.msra.gmra.mrb[16].mxu1 %v2098_v23 }
 0xc6d   : > { %v2201_v25 = vpop.f32.mrb[16].mxu1 }
 0xc6e   : > { %v2202_v26 = vadd.f32 %v2201_v25, %v2118_v11  ;;  %v2750_v30 = vpop.f32.mrb[17].mxu1 }
 0xc6f   : > { %v2204_v31 = vpop.f32.mrb[18].mxu1 }
 0xc70   : > { %v2751_v33 = vpop.f32.mrb[19].mxu1  ;;  %v2207_v56 = vadd.f32 %v2202_v26, %v2024_v63 }
 0xc72   : > { %v2208_v34 = vsel %vm670_vm2, %v2207_v56, 0.0 }
 0xc73   : > { %2209 = vadd.xlane.f32.xlu1 %v2208_v34 }
 0xd00   : > { %v2210_v35 = vpop.xlane.xlu1 %2209 }
 0xd01   : > { %v2211_v39 = vmul.f32 0.03125, %v2210_v35 }
 0xd03   : > { %v2212_v40 = vsub.f32 %v2207_v56, %v2211_v39 }
 0xd05   : > { %v2213_v41 = vmul.f32 %v2212_v40, %v2212_v40 }
 0xd07   : > { %v2214_v42 = vsel %vm670_vm2, %v2213_v41, 0.0 }
 0xd08   : > { %2215 = vadd.xlane.f32.xlu0 %v2214_v42 }
 0xd95   : > { %v2216_v43 = vpop.xlane.xlu0 %2215 }
 0xd96   : > { %v2217_v44 = vmul.f32 0.03125, %v2216_v43 }
 0xd98   : > { %v2218_v45 = vadd.f32 1e-12, %v2217_v44 }
 0xd9a   : > { %2966 = vrsqrt.f32 %v2218_v45 }
 0xda4   : > { %v2967_v28 = vpop.eup %2966 }
 0xda5   : > { %v2220_v51 = vmul.f32 %v2967_v28, %v2212_v40  ;;  %2235 = sbr.rel (%p2611_p8) target bundleno = 3716 (0xe84), region = 100 }
 0xda7   : > { %v2225_v52 = vmul.f32 %v2224_v49, %v2220_v51 }
 0xda9   : > { %v2230_v24 = vadd.f32 %v2229_v50, %v2225_v52 }
 0xdab   : > { %2231 = vst.msk [vmem:[#allocation2] sm:$0xff] %vm670_vm2, %v2230_v24  ;;  %v2236_v58 = vpack.c.bf16 (!%p2611_p8), %v2230_v24, %v2230_v24 }
 0xdad   : > { %2757 = vmatmul.mubr.msk.bf16.vlgmr.msra.gmra.mrb[0].mxu0 %vm670_vm2, %v2236_v58 }
 0xe80   : > { %v2294_v59 = vpop.f32.mrb[0].mxu0 }
 0xe81   : > { %v2295_v60 = vadd.f32 %v2294_v59, %v2244_v29  ;;  %v2758_v61 = vpop.f32.mrb[1].mxu0 }
 0xe82   : > { %v2297_v62 = vpop.f32.mrb[2].mxu0 }
 0xe83   : > { %2300 = vst [vmem:[%s3978_s6] sm:$0xff] %v2295_v60  ;;  %v2759_v63 = vpop.f32.mrb[3].mxu0 }
 0xe84 PF: > { %s4412_s27 = sld [smem:[#allocation31_spill]]  ;;  %s4413_s26 = sld [smem:[#allocation47_spill]] }
 0xe85   : > { %s2315_s30 = sshll.u32 %s3978_s6, 4  ;;  %s2302_s0 = scalar_lea.sflag [#allocation5], %s3926_s28  ;;  %s2316_s30 = int_to_ptr.vmem [resolvable:$true] %s2315_s30 }
 0xe86   : > { %s3236_s3 = scalar_lea.vmem %s2316_s30, 128  ;;  %p4414_p2 = scmp.ne.s32.totalorder %s4383_s7, 0 }
 0xe87   : > { %p3237_p3 = scmp.ne.s32.totalorder %s2316_s30, %s3236_s3  ;;  %s3409_s9 = smov [#allocation18]  }
 0xe88   : > { %s3240_s20 = sshll.u32 %s3409_s9, 4  ;;  %s3241_s20 = int_to_ptr.vmem [resolvable:$false] %s3240_s20 }
 0xe89   : > { %p3238_p1 = pnand %p3237_p3, %p4414_p2  ;;  %s3242_s21 = scalar_lea.vmem %s3241_s20, 256 }
 0xe8a   : > { %s2616_s8 = sshll.u32 %s4412_s27, 7  ;;  %p3243_p13 = scmp.lt.s32.totalorder %s2316_s30, %s3241_s20 }
 0xe8b   : > { %s4243_s23 = scalar_lea.hbm %s4413_s26, %s2616_s8  ;;  %p3239_p11 = pneg %p3238_p1 }
 0xe8c   : > { %p3244_p12 = scmp.lt.s32.totalorder %s3242_s21, %s3236_s3 }
 0xe8e   : > { %p3245_p9 = por %p3244_p12, %p3243_p13 }
 0xe90   : > { %p3246_p10 = pnand %p3245_p9, %p3239_p11 }
 0xe92   : > { %3249 = shalt.err (!%p3246_p10)
}
 0xe93   : > { %s3250_s28 = scalar_lea.hbm %s4243_s23, 128  ;;  %s3254_s29 = scalar_lea.hbm %s4413_s26, 256 }
 0xe94   : > { %p3251_p0 = scmp.ne.s32.totalorder %s4243_s23, %s3250_s28  ;;  %p3255_p4 = scmp.lt.u32.totalorder %s4243_s23, %s4413_s26 }
 0xe95   : > { %p3256_p7 = scmp.lt.u32.totalorder %s3254_s29, %s3250_s28  ;;  %p3258_p3 = scmp.lt.u32.totalorder %s3250_s28, %s4243_s23 }
 0xe96   : > { %p3252_p5 = pnand %p3251_p0, %p4414_p2 }
 0xe97   : > { %p3257_p8 = por %p3256_p7, %p3255_p4 }
 0xe98   : > { %p3253_p6 = pneg %p3252_p5 }
 0xe99   : > { %p3259_p1 = por %p3258_p3, %p3257_p8 }
 0xe9b   : > { %p3260_p11 = pnand %p3259_p1, %p3253_p6 }
 0xe9d   : > { %3263 = shalt.err (!%p3260_p11)
}
 0xe9e   : > { %2782 = dma.vmem_to_hbm [thread:$0]  (%p4414_p2), %s2316_s30, 128, %s4243_s23, %s2302_s0  }
 0xe9f PF: > { %p2822_p13 = scmp.ge.s32.totalorder %s3382_s19, 2  ;;  %s2327_s2 = sand.u32 1, %s3354_s12  }
 0xea0   : > { %p4415_p12 = scmp.ne.s32.totalorder %s4385_s5, 0  ;;  %s2328_s11 = scalar_lea.sflag [#allocation5], %s2327_s2 }
 0xea2   : > { %p2814_p9 = pnand %p2822_p13, %p4415_p12 }
 0xea4   : > { %3337 = dma.done.wait (!%p2814_p9), %s2328_s11, 128  }
 0xea5   : > { %3339 = vsyncadd (!%p2814_p9), %s2328_s11, 4294967168  ;;  %s37_s19 = sadd.s32 1, %s3382_s19   ;;  %s4416_s30 = sld [smem:[#allocation27_spill]] }
 0xea6   : > { %p34_p10 = scmp.ge.s32.totalorder %s37_s19, 6   ;;  %s4417_s10 = sld [smem:[#allocation28_spill]] }
 0xea7   : > { %s4418_s11 = sld [smem:[#allocation37_spill]]  ;;  %s4419_s7 = sld [smem:[#allocation29_spill]] }
 0xea8   : > { %s4420_s14 = sld [smem:[#allocation38_spill]]  ;;  %s4421_s24 = sld [smem:[#allocation35_spill]] }
 0xea9   : > { %s4422_s27 = sld [smem:[#allocation36_spill]]  ;;  %s4423_s12 = smov %s3358_s13 }
 0xeaa   : > { %s4425_s15 = smov %s3374_s17  ;;  %s4426_s16 = smov %s3378_s18 }
 0xeab   :  { %36 = sbr.rel (!%p34_p10) target bundleno = 27 (0x1b), region = 191 }
 0xead   : > { %s4424_s13 = smov %s4419_s7 }
 0xeae   : > { %s4427_s17 = smov %s4421_s24 }
 0xeaf   : > { %s4428_s18 = smov %s4422_s27 }
 0xeb2   :  { %2333 = vsyncpa [#allocation4], 1 }
 0xeb3   :  { %2335 = vsyncpa [#allocation4 + $0x1], 1 }
 0xeb4   :  { %2336 = vsyncpa [#allocation7], 1 }
 0xeb5   :  { %2338 = vsyncpa [#allocation7 + $0x1], 1 }
 0xeb6   :  { %2339 = vsyncpa [#allocation10], 1 }
 0xeb7   :  { %2341 = vsyncpa [#allocation10 + $0x1], 1 }
 0xeb8   :  { %2342 = vsyncpa [#allocation13], 1 }
 0xeb9   :  { %2344 = vsyncpa [#allocation13 + $0x1], 1 }
 0xeba   :  { %2345 = vsyncpa [#allocation16], 1 }
 0xebb   :  { %2347 = vsyncpa [#allocation16 + $0x1], 1 }
 0xebc   :  { %2348 = vsyncpa [#allocation5], 1 }
 0xebd   :  { %2350 = vsyncpa [#allocation5 + $0x1], 1 }

</bundles_post_ra>
